<compile_context>
chip_gen: v7x
topology: tpu7x:2x2x1
jax: 0.10.0
libtpu: 0.0.40
codegen_flags: <defaults>
</compile_context>

<pallas_src>
import math
from functools import partial

import jax
import jax.numpy as jnp
import numpy as np
from jax.experimental import pallas as pl
from jax.experimental.pallas import tpu as pltpu

EPS = 1e-5  # nn.LayerNorm default eps


def _round_up(x, m):
    return ((x + m - 1) // m) * m


# ----------------------------------------------------------------------------
# Shared math (pure jnp; usable inside Pallas kernels and in the reference)
# ----------------------------------------------------------------------------
def _layernorm(v, w, b):
    mu = jnp.mean(v, axis=-1, keepdims=True)
    var = jnp.mean((v - mu) ** 2, axis=-1, keepdims=True)
    return (v - mu) * jax.lax.rsqrt(var + EPS) * w + b


def _extract_patches(x, patch_size, k_padded):
    # x: (B, C, H, W) NCHW  ->  (B, num_patches, k_padded) with zero-padded K
    B, C, H, W = x.shape
    gh, gw = H // patch_size, W // patch_size
    x = x.reshape(B, C, gh, patch_size, gw, patch_size)
    x = x.transpose(0, 2, 4, 1, 3, 5)                      # (B, gh, gw, C, p, p)
    p = x.reshape(B, gh * gw, C * patch_size * patch_size)
    k = p.shape[-1]
    if k_padded > k:
        p = jnp.pad(p, ((0, 0), (0, 0), (0, k_padded - k)))
    return p


def _physical_vmem_cap():
    phys = 128 * 1024 * 1024
    try:
        info = pltpu.get_tpu_info()
        phys = int(getattr(info, "vmem_capacity_bytes", phys) or phys)
    except Exception:
        pass
    # Leave pipelining/compiler headroom: ~102 MiB on 128 MiB parts (v5e/v6e),
    # ~51 MiB on 64 MiB parts (v7x).
    return int(phys * 0.8)


# ----------------------------------------------------------------------------
# Pallas kernels
# ----------------------------------------------------------------------------
def _patch_matmul_kernel(a_ref, b_ref, o_ref):
    # (tm, Kp) bf16 @ (Kp, width) bf16 -> bf16 tokens (f32 accumulate on MXU)
    o_ref[...] = jnp.dot(a_ref[...], b_ref[...],
                         preferred_element_type=jnp.float32).astype(o_ref.dtype)


def _fused_vit_kernel(tok_ref, poscls_ref, lnpre_w_ref, lnpre_b_ref,
                      ln1w_ref, ln1b_ref, wqkv_ref, bqkv_ref, wo_ref, bo_ref,
                      ln2w_ref, ln2b_ref, wfc_ref, bfc_ref, wpr_ref, bpr_ref,
                      lnpo_w_ref, lnpo_b_ref, proj_ref,
                      out_ref,
                      act_ref, cls_ref, head_buf_ref,
                      *, n_head, batch):
    """grid = (num_layers,).  The (B, L, D) residual stream is VMEM-resident
    (act_ref scratch) for the whole layer loop; per-layer weights stream in
    once per layer and are reused across every batch element."""
    layer = pl.program_id(0)
    n_layers = pl.num_programs(0)

    # ---- layer 0: embed (cls folded into pos row 0 host-side) + ln_pre -----
    # Single aligned full-block store (no off-sublane row-1 writes).
    @pl.when(layer == 0)
    def _():
        emb = tok_ref[...].astype(jnp.float32) + poscls_ref[...][None]
        act_ref[...] = _layernorm(emb, lnpre_w_ref[...], lnpre_b_ref[...])

    # Per-layer weights: read once per grid step, reused across the batch loop.
    ln1w, ln1b = ln1w_ref[...], ln1b_ref[...]
    wqkv, bqkv = wqkv_ref[...], bqkv_ref[...]
    wo, bo = wo_ref[...], bo_ref[...]
    ln2w, ln2b = ln2w_ref[...], ln2b_ref[...]
    wfc, bfc = wfc_ref[...], bfc_ref[...]
    wpr, bpr = wpr_ref[...], bpr_ref[...]

    D = wo.shape[0]
    hd = D // n_head
    scale = 1.0 / math.sqrt(hd)

    # TODO(synk): for large batches use lax.fori_loop over b (bounded code
    # size) and/or split the batch across the two v7x TensorCores (core_map).
    for b in range(batch):
        x = act_ref[b]                                         # (L, D) f32

        # --- attention branch ---------------------------------------------
        h = _layernorm(x, ln1w, ln1b).astype(jnp.bfloat16)
        qkv = jnp.dot(h, wqkv, preferred_element_type=jnp.float32) + bqkv
        # split / scale / cast q, k, v exactly once (not per head)
        q = (qkv[:, :D] * scale).astype(jnp.bfloat16)
        k = qkv[:, D:2 * D].astype(jnp.bfloat16)
        v = qkv[:, 2 * D:].astype(jnp.bfloat16)

        # TODO(synk): at production widths (hd = 64) use a head-batched
        # dot_general on a head-major layout (or >=2 heads per iteration) so
        # the score / PV matmul minor dims reach the full 128 MXU lanes.
        for hh in range(n_head):
            lo = hh * hd
            qh = q[:, lo:lo + hd]
            kh = k[:, lo:lo + hd]
            vh = v[:, lo:lo + hd]
            s = jax.lax.dot_general(qh, kh, (((1,), (1,)), ((), ())),
                                    preferred_element_type=jnp.float32)   # (L, L)
            s = s - jnp.max(s, axis=-1, keepdims=True)
            p = jnp.exp(s)
            p = p * pl.reciprocal(jnp.sum(p, axis=-1, keepdims=True), approx=True)
            oh = jnp.dot(p.astype(jnp.bfloat16), vh,
                         preferred_element_type=jnp.float32)              # (L, hd)
            head_buf_ref[:, pl.ds(lo, hd)] = oh
        # ONE output projection over all concatenated heads (full-K matmul).
        attn = jnp.dot(head_buf_ref[...].astype(jnp.bfloat16), wo,
                       preferred_element_type=jnp.float32) + bo
        x = x + attn

        # --- MLP branch: c_fc -> QuickGELU -> c_proj ------------------------
        # TODO(synk): bf16 GELU intermediate on v6e/v7x; tile the 4D hidden
        # dim with an inner emit_pipeline for ViT-L-class widths on v7x.
        h2 = _layernorm(x, ln2w, ln2b).astype(jnp.bfloat16)
        f = jnp.dot(h2, wfc, preferred_element_type=jnp.float32) + bfc
        f = f * jax.nn.sigmoid(1.702 * f)
        f = jnp.dot(f.astype(jnp.bfloat16), wpr,
                    preferred_element_type=jnp.float32) + bpr
        x = x + f

        act_ref[b] = x
        cls_ref[pl.ds(b, 1), :] = x[0:1, :]

    # ---- last layer: ln_post on class tokens + output projection -----------
    @pl.when(layer == n_layers - 1)
    def _():
        c = _layernorm(cls_ref[...], lnpo_w_ref[...], lnpo_b_ref[...])
        out_ref[...] = jnp.dot(c.astype(jnp.bfloat16), proj_ref[...],
                               preferred_element_type=jnp.float32)


# ----------------------------------------------------------------------------
# Forward pass
# ----------------------------------------------------------------------------
def visual_transformer_forward(x, params, *, patch_size, n_head):
    B = x.shape[0]
    Kp, width = params['conv_w'].shape
    embed_dim = params['proj'].shape[1]
    n_layers = params['wqkv'].shape[0]

    # ---- 1) conv1 (stride == kernel, bias=False): patch extract + matmul ----
    patches = _extract_patches(x, patch_size, Kp)            # (B, np, Kp) f32
    npatch = patches.shape[1]
    L = npatch + 1
    M = B * npatch
    tm = M if M <= 1024 else 1024                            # large, even row tile
    tok = pl.pallas_call(
        _patch_matmul_kernel,
        grid=(pl.cdiv(M, tm),),
        in_specs=[pl.BlockSpec((tm, Kp), lambda i: (i, 0)),
                  pl.BlockSpec((Kp, width), lambda i: (0, 0))],
        out_specs=pl.BlockSpec((tm, width), lambda i: (i, 0)),
        out_shape=jax.ShapeDtypeStruct((M, width), jnp.bfloat16),
        compiler_params=pltpu.CompilerParams(dimension_semantics=("parallel",)),
    )(patches.reshape(M, Kp).astype(jnp.bfloat16), params['conv_w'])
    tok = tok.reshape(B, npatch, width)
    # zero row 0 (class-token slot); the class embedding is folded into pos[0]
    tok = jnp.pad(tok, ((0, 0), (1, 0), (0, 0)))             # (B, L, width) bf16
    poscls = params['pos'].at[0:1, :].add(params['cls'])     # (L, width) f32

    # ---- 2) embed + ALL transformer blocks + ln_post + proj, fused ----------
    wnames = ('ln1w', 'ln1b', 'wqkv', 'bqkv', 'wo', 'bo',
              'ln2w', 'ln2b', 'wfc', 'bfc', 'wpr', 'bpr')
    weights = [params[n] for n in wnames]                    # each (layers, r, c)
    w_specs = [pl.BlockSpec((None,) + w.shape[1:], lambda l: (l, 0, 0))
               for w in weights]

    def _const_spec(a):
        nd = a.ndim
        return pl.BlockSpec(a.shape, lambda l, _nd=nd: (0,) * _nd)

    # VMEM request: double-buffered per-layer weights + resident tokens /
    # scratches / temporaries, capped to the local chip's physical VMEM.
    per_layer_w = sum(int(np.prod(w.shape[1:])) * w.dtype.itemsize for w in weights)
    scratch_bytes = B * L * width * 4 + B * width * 4 + L * width * 4
    inter_bytes = 8 * L * (3 * width + 4 * width) * 4
    want = (2 * per_layer_w + 2 * int(tok.size) * 2 + scratch_bytes
            + inter_bytes + 2 * B * embed_dim * 4 + (8 << 20))
    vmem_limit = min(_physical_vmem_cap(), max(32 << 20, int(want)))

    out = pl.pallas_call(
        partial(_fused_vit_kernel, n_head=n_head, batch=B),
        grid=(n_layers,),
        in_specs=[pl.BlockSpec((B, L, width), lambda l: (0, 0, 0)),   # tokens
                  _const_spec(poscls),
                  _const_spec(params['ln_pre_w']), _const_spec(params['ln_pre_b'])]
                 + w_specs
                 + [_const_spec(params['ln_post_w']), _const_spec(params['ln_post_b']),
                    _const_spec(params['proj'])],
        out_specs=pl.BlockSpec((B, embed_dim), lambda l: (0, 0)),
        out_shape=jax.ShapeDtypeStruct((B, embed_dim), jnp.float32),
        scratch_shapes=[pltpu.VMEM((B, L, width), jnp.float32),  # resident residual stream
                        pltpu.VMEM((B, width), jnp.float32),     # class-token rows
                        pltpu.VMEM((L, width), jnp.float32)],    # concatenated head outputs
        compiler_params=pltpu.CompilerParams(
            dimension_semantics=("arbitrary",),
            vmem_limit_bytes=int(vmem_limit)),
    )(tok, poscls, params['ln_pre_w'], params['ln_pre_b'],
      *weights,
      params['ln_post_w'], params['ln_post_b'], params['proj'])
    return out


# ----------------------------------------------------------------------------
# Deterministic parameter init (mirrors module __init__ / initialize_parameters)
# Weight matrices are stored bf16 (MXU-native); biases / LN params stay f32.
# Per-layer tensors are stacked along a leading (num_layers, ...) axis.
# ----------------------------------------------------------------------------
def init_params(key, *, input_resolution, patch_size, width, layers, heads, embed_dim):
    del heads  # head count is a runtime config, not a parameter shape
    npatch = (input_resolution // patch_size) ** 2
    L = npatch + 1
    scale = width ** -0.5
    proj_std = (width ** -0.5) * ((2 * layers) ** -0.5)
    attn_std = width ** -0.5
    fc_std = (2 * width) ** -0.5
    K = 3 * patch_size * patch_size
    Kp = _round_up(K, 128)

    keys = iter(jax.random.split(key, 8 + 8 * layers))
    nrm = lambda shape, std: std * jax.random.normal(next(keys), shape, jnp.float32)

    conv_w = jnp.pad(nrm((K, width), 0.02), ((0, Kp - K), (0, 0)))

    params = {
        'conv_w': conv_w.astype(jnp.bfloat16),               # (Kp, width)
        'cls': nrm((1, width), scale),
        'pos': nrm((L, width), 0.01),
        'ln_pre_w': jnp.ones((1, width), jnp.float32),
        'ln_pre_b': jnp.zeros((1, width), jnp.float32),
        'ln_post_w': jnp.ones((1, width), jnp.float32),
        'ln_post_b': jnp.zeros((1, width), jnp.float32),
        'proj': nrm((width, embed_dim), scale).astype(jnp.bfloat16),
        # ---- stacked per-layer transformer weights ----
        'ln1w': jnp.ones((layers, 1, width), jnp.float32),
        'ln1b': jnp.zeros((layers, 1, width), jnp.float32),
        'ln2w': jnp.ones((layers, 1, width), jnp.float32),
        'ln2b': jnp.zeros((layers, 1, width), jnp.float32),
        'wqkv': jnp.stack([nrm((3 * width, width), attn_std).T
                           for _ in range(layers)]).astype(jnp.bfloat16),   # (l, D, 3D)
        'bqkv': jnp.zeros((layers, 1, 3 * width), jnp.float32),
        'wo': jnp.stack([nrm((width, width), proj_std).T
                         for _ in range(layers)]).astype(jnp.bfloat16),     # (l, D, D)
        'bo': jnp.zeros((layers, 1, width), jnp.float32),
        'wfc': jnp.stack([nrm((4 * width, width), fc_std).T
                          for _ in range(layers)]).astype(jnp.bfloat16),    # (l, D, 4D)
        'bfc': jnp.stack([nrm((1, 4 * width), 0.01) for _ in range(layers)]),
        'wpr': jnp.stack([nrm((width, 4 * width), proj_std).T
                          for _ in range(layers)]).astype(jnp.bfloat16),    # (l, 4D, D)
        'bpr': jnp.stack([nrm((1, width), 0.01) for _ in range(layers)]),
    }
    return params


# ----------------------------------------------------------------------------
# Pure-JAX f32 reference (same semantics as the PyTorch forward)
# ----------------------------------------------------------------------------
def reference_forward(x, params, *, patch_size, n_head):
    hp = jax.lax.Precision.HIGHEST
    Kp, width = params['conv_w'].shape
    patches = _extract_patches(x, patch_size, Kp)
    B = patches.shape[0]
    conv_w = params['conv_w'].astype(jnp.float32)
    tok = jnp.einsum('bpk,kd->bpd', patches, conv_w, precision=hp)
    cls = jnp.broadcast_to(params['cls'][None], (B, 1, width))
    t = jnp.concatenate([cls, tok], axis=1) + params['pos'][None]
    t = _layernorm(t, params['ln_pre_w'], params['ln_pre_b'])
    L = t.shape[1]
    hd = width // n_head
    scale = 1.0 / math.sqrt(hd)
    for i in range(params['wqkv'].shape[0]):
        wqkv = params['wqkv'][i].astype(jnp.float32)
        wo = params['wo'][i].astype(jnp.float32)
        wfc = params['wfc'][i].astype(jnp.float32)
        wpr = params['wpr'][i].astype(jnp.float32)
        h = _layernorm(t, params['ln1w'][i], params['ln1b'][i])
        qkv = jnp.einsum('bld,de->ble', h, wqkv, precision=hp) + params['bqkv'][i]
        q = (qkv[..., :width] * scale).reshape(B, L, n_head, hd)
        k = qkv[..., width:2 * width].reshape(B, L, n_head, hd)
        v = qkv[..., 2 * width:].reshape(B, L, n_head, hd)
        s = jnp.einsum('blhd,bmhd->bhlm', q, k, precision=hp)
        p = jax.nn.softmax(s, axis=-1)
        o = jnp.einsum('bhlm,bmhd->blhd', p, v, precision=hp).reshape(B, L, width)
        t = t + jnp.einsum('bld,de->ble', o, wo, precision=hp) + params['bo'][i]
        h2 = _layernorm(t, params['ln2w'][i], params['ln2b'][i])
        f = jnp.einsum('bld,de->ble', h2, wfc, precision=hp) + params['bfc'][i]
        f = f * jax.nn.sigmoid(1.702 * f)
        t = t + jnp.einsum('bld,de->ble', f, wpr, precision=hp) + params['bpr'][i]
    out = _layernorm(t[:, 0, :], params['ln_post_w'], params['ln_post_b'])
    return jnp.dot(out, params['proj'].astype(jnp.float32), precision=hp)


if __name__ == "__main__":
    cfg = dict(input_resolution=16, patch_size=8, width=32, layers=2, heads=4, embed_dim=32)
    key = jax.random.PRNGKey(0)
    pkey, xkey = jax.random.split(key)
    params = init_params(pkey, **cfg)
    x = jax.random.normal(xkey, (2, 3, cfg['input_resolution'], cfg['input_resolution']),
                          jnp.float32)

    fwd = jax.jit(partial(visual_transformer_forward,
                          patch_size=cfg['patch_size'], n_head=cfg['heads']))
    out = jax.block_until_ready(fwd(x, params))
    assert out.shape == (2, cfg['embed_dim'])

    ref = reference_forward(x, params, patch_size=cfg['patch_size'], n_head=cfg['heads'])
    np.testing.assert_allclose(np.asarray(out), np.asarray(ref), rtol=5e-2, atol=5e-2)
    print("KERNEL_OK")
</pallas_src>

<mosaic_0001>
module attributes {stable_mosaic.version = 11 : i64} {
  func.func @_patch_matmul_kernel(%arg0: i32, %arg1: memref<8x256xbf16, #tpu.memory_space<vmem>>, %arg2: memref<256x32xbf16, #tpu.memory_space<vmem>>, %arg3: memref<8x32xbf16, #tpu.memory_space<vmem>>) attributes {dimension_semantics = [#tpu.dimension_semantics<parallel>], iteration_bounds = array<i64: 1>, scalar_prefetch = 0 : i64, scratch_operands = 0 : i64, tpu.core_type = #tpu.core_type<tc>, window_params = [{transform_indices = @transform_0, window_bounds = array<i64: 8, 256>}, {pipeline_mode = #tpu.pipeline_mode<synchronous>, transform_indices = @transform_1, window_bounds = array<i64: 256, 32>}, {transform_indices = @transform_2, window_bounds = array<i64: 8, 32>}]} {
    %c0 = arith.constant 0 : index
    %c0_0 = arith.constant 0 : index
    %0 = vector.load %arg1[%c0, %c0_0] : memref<8x256xbf16, #tpu.memory_space<vmem>>, vector<8x256xbf16>
    %c0_1 = arith.constant 0 : index
    %c0_2 = arith.constant 0 : index
    %1 = vector.load %arg2[%c0_1, %c0_2] : memref<256x32xbf16, #tpu.memory_space<vmem>>, vector<256x32xbf16>
    %cst = arith.constant dense<0.000000e+00> : vector<8x32xf32>
    %2 = tpu.matmul %0, %1, %cst {dimension_numbers = #tpu.dot_dimension_numbers<[1], [0], [0], [1], [0, 0, 1, 1], [], []>} : vector<8x256xbf16>, vector<256x32xbf16>, vector<8x32xf32> -> vector<8x32xf32>
    %3 = arith.truncf %2 : vector<8x32xf32> to vector<8x32xbf16>
    %c0_3 = arith.constant 0 : index
    %c0_4 = arith.constant 0 : index
    %4 = vector.load %arg3[%c0_3, %c0_4] : memref<8x32xbf16, #tpu.memory_space<vmem>>, vector<8x32xbf16>
    tpu.vector_store %arg3[%c0_3, %c0_4], %3 {strides = array<i32>} : memref<8x32xbf16, #tpu.memory_space<vmem>>, vector<8x32xbf16>,
    return
  }
  func.func @transform_0(%arg0: i32) -> (i32, i32) {
    %c0_i32 = arith.constant 0 : i32
    %c0_i32_0 = arith.constant 0 : i32
    return %arg0, %c0_i32 : i32, i32
  }
  func.func @transform_1(%arg0: i32) -> (i32, i32) {
    %c0_i32 = arith.constant 0 : i32
    %c0_i32_0 = arith.constant 0 : i32
    %c0_i32_1 = arith.constant 0 : i32
    return %c0_i32, %c0_i32_0 : i32, i32
  }
  func.func @transform_2(%arg0: i32) -> (i32, i32) {
    %c0_i32 = arith.constant 0 : i32
    %c0_i32_0 = arith.constant 0 : i32
    return %arg0, %c0_i32 : i32, i32
  }
}

module attributes {stable_mosaic.version = 11 : i64} {
  func.func @_fused_vit_kernel(%arg0: i32, %arg1: memref<2x5x32xbf16, #tpu.memory_space<vmem>>, %arg2: memref<5x32xf32, #tpu.memory_space<vmem>>, %arg3: memref<1x32xf32, #tpu.memory_space<vmem>>, %arg4: memref<1x32xf32, #tpu.memory_space<vmem>>, %arg5: memref<1x1x32xf32, #tpu.memory_space<vmem>>, %arg6: memref<1x1x32xf32, #tpu.memory_space<vmem>>, %arg7: memref<1x32x96xbf16, #tpu.memory_space<vmem>>, %arg8: memref<1x1x96xf32, #tpu.memory_space<vmem>>, %arg9: memref<1x32x32xbf16, #tpu.memory_space<vmem>>, %arg10: memref<1x1x32xf32, #tpu.memory_space<vmem>>, %arg11: memref<1x1x32xf32, #tpu.memory_space<vmem>>, %arg12: memref<1x1x32xf32, #tpu.memory_space<vmem>>, %arg13: memref<1x32x128xbf16, #tpu.memory_space<vmem>>, %arg14: memref<1x1x128xf32, #tpu.memory_space<vmem>>, %arg15: memref<1x128x32xbf16, #tpu.memory_space<vmem>>, %arg16: memref<1x1x32xf32, #tpu.memory_space<vmem>>, %arg17: memref<1x32xf32, #tpu.memory_space<vmem>>, %arg18: memref<1x32xf32, #tpu.memory_space<vmem>>, %arg19: memref<32x32xbf16, #tpu.memory_space<vmem>>, %arg20: memref<2x32xf32, #tpu.memory_space<vmem>>, %arg21: memref<2x5x32xf32, #tpu.memory_space<vmem>>, %arg22: memref<2x32xf32, #tpu.memory_space<vmem>>, %arg23: memref<5x32xf32, #tpu.memory_space<vmem>>) attributes {dimension_semantics = [#tpu.dimension_semantics<arbitrary>], iteration_bounds = array<i64: 2>, scalar_prefetch = 0 : i64, scratch_operands = 3 : i64, tpu.core_type = #tpu.core_type<tc>, window_params = [{pipeline_mode = #tpu.pipeline_mode<synchronous>, transform_indices = @transform_0, window_bounds = array<i64: 2, 5, 32>}, {pipeline_mode = #tpu.pipeline_mode<synchronous>, transform_indices = @transform_1, window_bounds = array<i64: 5, 32>}, {pipeline_mode = #tpu.pipeline_mode<synchronous>, transform_indices = @transform_2, window_bounds = array<i64: 1, 32>}, {pipeline_mode = #tpu.pipeline_mode<synchronous>, transform_indices = @transform_3, window_bounds = array<i64: 1, 32>}, {transform_indices = @transform_4, window_bounds = array<i64: 1, 1, 32>}, {transform_indices = @transform_5, window_bounds = array<i64: 1, 1, 32>}, {transform_indices = @transform_6, window_bounds = array<i64: 1, 32, 96>}, {transform_indices = @transform_7, window_bounds = array<i64: 1, 1, 96>}, {transform_indices = @transform_8, window_bounds = array<i64: 1, 32, 32>}, {transform_indices = @transform_9, window_bounds = array<i64: 1, 1, 32>}, {transform_indices = @transform_10, window_bounds = array<i64: 1, 1, 32>}, {transform_indices = @transform_11, window_bounds = array<i64: 1, 1, 32>}, {transform_indices = @transform_12, window_bounds = array<i64: 1, 32, 128>}, {transform_indices = @transform_13, window_bounds = array<i64: 1, 1, 128>}, {transform_indices = @transform_14, window_bounds = array<i64: 1, 128, 32>}, {transform_indices = @transform_15, window_bounds = array<i64: 1, 1, 32>}, {pipeline_mode = #tpu.pipeline_mode<synchronous>, transform_indices = @transform_16, window_bounds = array<i64: 1, 32>}, {pipeline_mode = #tpu.pipeline_mode<synchronous>, transform_indices = @transform_17, window_bounds = array<i64: 1, 32>}, {pipeline_mode = #tpu.pipeline_mode<synchronous>, transform_indices = @transform_18, window_bounds = array<i64: 32, 32>}, {pipeline_mode = #tpu.pipeline_mode<synchronous>, transform_indices = @transform_19, window_bounds = array<i64: 2, 32>}]} {
    %c0_i32 = arith.constant 0 : i32
    %0 = arith.cmpi eq, %arg0, %c0_i32 : i32
    %1 = arith.extui %0 : i1 to i32
    %c0_i32_0 = arith.constant 0 : i32
    %2 = arith.cmpi ne, %1, %c0_i32_0 : i32
    scf.if %2 {
      %c0_134 = arith.constant 0 : index
      %c0_135 = arith.constant 0 : index
      %c0_136 = arith.constant 0 : index
      %338 = vector.load %arg1[%c0_134, %c0_135, %c0_136] : memref<2x5x32xbf16, #tpu.memory_space<vmem>>, vector<2x5x32xbf16>
      %339 = arith.extf %338 : vector<2x5x32xbf16> to vector<2x5x32xf32>
      %c0_137 = arith.constant 0 : index
      %c0_138 = arith.constant 0 : index
      %340 = vector.load %arg2[%c0_137, %c0_138] : memref<5x32xf32, #tpu.memory_space<vmem>>, vector<5x32xf32>
      %341 = vector.shape_cast %340 : vector<5x32xf32> to vector<1x5x32xf32>
      %342 = vector.broadcast %341 : vector<1x5x32xf32> to vector<2x5x32xf32>
      %343 = arith.addf %339, %342 : vector<2x5x32xf32>
      %c0_139 = arith.constant 0 : index
      %c0_140 = arith.constant 0 : index
      %344 = vector.load %arg3[%c0_139, %c0_140] : memref<1x32xf32, #tpu.memory_space<vmem>>, vector<1x32xf32>
      %c0_141 = arith.constant 0 : index
      %c0_142 = arith.constant 0 : index
      %345 = vector.load %arg4[%c0_141, %c0_142] : memref<1x32xf32, #tpu.memory_space<vmem>>, vector<1x32xf32>
      %cst_143 = arith.constant dense<0.000000e+00> : vector<2x5xf32>
      %346 = vector.multi_reduction <add>, %343, %cst_143 [2] : vector<2x5x32xf32> to vector<2x5xf32>
      %347 = vector.shape_cast %346 : vector<2x5xf32> to vector<2x5x1xf32>
      %cst_144 = arith.constant 3.200000e+01 : f32
      %348 = vector.broadcast %cst_144 : f32 to vector<2x5x1xf32>
      %349 = arith.divf %347, %348 : vector<2x5x1xf32>
      %350 = vector.broadcast %349 : vector<2x5x1xf32> to vector<2x5x32xf32>
      %351 = arith.subf %343, %350 : vector<2x5x32xf32>
      %352 = arith.mulf %351, %351 : vector<2x5x32xf32>
      %cst_145 = arith.constant dense<0.000000e+00> : vector<2x5xf32>
      %353 = vector.multi_reduction <add>, %352, %cst_145 [2] : vector<2x5x32xf32> to vector<2x5xf32>
      %354 = vector.shape_cast %353 : vector<2x5xf32> to vector<2x5x1xf32>
      %cst_146 = arith.constant 3.200000e+01 : f32
      %355 = vector.broadcast %cst_146 : f32 to vector<2x5x1xf32>
      %356 = arith.divf %354, %355 : vector<2x5x1xf32>
      %357 = vector.broadcast %349 : vector<2x5x1xf32> to vector<2x5x32xf32>
      %358 = arith.subf %343, %357 : vector<2x5x32xf32>
      %cst_147 = arith.constant 9.99999974E-6 : f32
      %359 = vector.broadcast %cst_147 : f32 to vector<2x5x1xf32>
      %360 = arith.addf %356, %359 : vector<2x5x1xf32>
      %361 = math.rsqrt %360 : vector<2x5x1xf32>
      %362 = vector.broadcast %361 : vector<2x5x1xf32> to vector<2x5x32xf32>
      %363 = arith.mulf %358, %362 : vector<2x5x32xf32>
      %364 = vector.shape_cast %344 : vector<1x32xf32> to vector<1x1x32xf32>
      %365 = vector.broadcast %364 : vector<1x1x32xf32> to vector<2x5x32xf32>
      %366 = arith.mulf %363, %365 : vector<2x5x32xf32>
      %367 = vector.shape_cast %345 : vector<1x32xf32> to vector<1x1x32xf32>
      %368 = vector.broadcast %367 : vector<1x1x32xf32> to vector<2x5x32xf32>
      %369 = arith.addf %366, %368 : vector<2x5x32xf32>
      %c0_148 = arith.constant 0 : index
      %c0_149 = arith.constant 0 : index
      %c0_150 = arith.constant 0 : index
      %370 = vector.load %arg21[%c0_148, %c0_149, %c0_150] : memref<2x5x32xf32, #tpu.memory_space<vmem>>, vector<2x5x32xf32>
      tpu.vector_store %arg21[%c0_148, %c0_149, %c0_150], %369 {strides = array<i32>} : memref<2x5x32xf32, #tpu.memory_space<vmem>>, vector<2x5x32xf32>,
    } else {
    }
    %c0 = arith.constant 0 : index
    %c0_1 = arith.constant 0 : index
    %c0_2 = arith.constant 0 : index
    %3 = vector.load %arg5[%c0, %c0_1, %c0_2] : memref<1x1x32xf32, #tpu.memory_space<vmem>>, vector<1x1x32xf32>
    %4 = vector.shape_cast %3 : vector<1x1x32xf32> to vector<1x32xf32>
    %c0_3 = arith.constant 0 : index
    %c0_4 = arith.constant 0 : index
    %c0_5 = arith.constant 0 : index
    %5 = vector.load %arg6[%c0_3, %c0_4, %c0_5] : memref<1x1x32xf32, #tpu.memory_space<vmem>>, vector<1x1x32xf32>
    %6 = vector.shape_cast %5 : vector<1x1x32xf32> to vector<1x32xf32>
    %c0_6 = arith.constant 0 : index
    %c0_7 = arith.constant 0 : index
    %c0_8 = arith.constant 0 : index
    %7 = vector.load %arg7[%c0_6, %c0_7, %c0_8] : memref<1x32x96xbf16, #tpu.memory_space<vmem>>, vector<1x32x96xbf16>
    %8 = vector.shape_cast %7 : vector<1x32x96xbf16> to vector<32x96xbf16>
    %c0_9 = arith.constant 0 : index
    %c0_10 = arith.constant 0 : index
    %c0_11 = arith.constant 0 : index
    %9 = vector.load %arg8[%c0_9, %c0_10, %c0_11] : memref<1x1x96xf32, #tpu.memory_space<vmem>>, vector<1x1x96xf32>
    %10 = vector.shape_cast %9 : vector<1x1x96xf32> to vector<1x96xf32>
    %c0_12 = arith.constant 0 : index
    %c0_13 = arith.constant 0 : index
    %c0_14 = arith.constant 0 : index
    %11 = vector.load %arg9[%c0_12, %c0_13, %c0_14] : memref<1x32x32xbf16, #tpu.memory_space<vmem>>, vector<1x32x32xbf16>
    %12 = vector.shape_cast %11 : vector<1x32x32xbf16> to vector<32x32xbf16>
    %c0_15 = arith.constant 0 : index
    %c0_16 = arith.constant 0 : index
    %c0_17 = arith.constant 0 : index
    %13 = vector.load %arg10[%c0_15, %c0_16, %c0_17] : memref<1x1x32xf32, #tpu.memory_space<vmem>>, vector<1x1x32xf32>
    %14 = vector.shape_cast %13 : vector<1x1x32xf32> to vector<1x32xf32>
    %c0_18 = arith.constant 0 : index
    %c0_19 = arith.constant 0 : index
    %c0_20 = arith.constant 0 : index
    %15 = vector.load %arg11[%c0_18, %c0_19, %c0_20] : memref<1x1x32xf32, #tpu.memory_space<vmem>>, vector<1x1x32xf32>
    %16 = vector.shape_cast %15 : vector<1x1x32xf32> to vector<1x32xf32>
    %c0_21 = arith.constant 0 : index
    %c0_22 = arith.constant 0 : index
    %c0_23 = arith.constant 0 : index
    %17 = vector.load %arg12[%c0_21, %c0_22, %c0_23] : memref<1x1x32xf32, #tpu.memory_space<vmem>>, vector<1x1x32xf32>
    %18 = vector.shape_cast %17 : vector<1x1x32xf32> to vector<1x32xf32>
    %c0_24 = arith.constant 0 : index
    %c0_25 = arith.constant 0 : index
    %c0_26 = arith.constant 0 : index
    %19 = vector.load %arg13[%c0_24, %c0_25, %c0_26] : memref<1x32x128xbf16, #tpu.memory_space<vmem>>, vector<1x32x128xbf16>
    %20 = vector.shape_cast %19 : vector<1x32x128xbf16> to vector<32x128xbf16>
    %c0_27 = arith.constant 0 : index
    %c0_28 = arith.constant 0 : index
    %c0_29 = arith.constant 0 : index
    %21 = vector.load %arg14[%c0_27, %c0_28, %c0_29] : memref<1x1x128xf32, #tpu.memory_space<vmem>>, vector<1x1x128xf32>
    %22 = vector.shape_cast %21 : vector<1x1x128xf32> to vector<1x128xf32>
    %c0_30 = arith.constant 0 : index
    %c0_31 = arith.constant 0 : index
    %c0_32 = arith.constant 0 : index
    %23 = vector.load %arg15[%c0_30, %c0_31, %c0_32] : memref<1x128x32xbf16, #tpu.memory_space<vmem>>, vector<1x128x32xbf16>
    %24 = vector.shape_cast %23 : vector<1x128x32xbf16> to vector<128x32xbf16>
    %c0_33 = arith.constant 0 : index
    %c0_34 = arith.constant 0 : index
    %c0_35 = arith.constant 0 : index
    %25 = vector.load %arg16[%c0_33, %c0_34, %c0_35] : memref<1x1x32xf32, #tpu.memory_space<vmem>>, vector<1x1x32xf32>
    %26 = vector.shape_cast %25 : vector<1x1x32xf32> to vector<1x32xf32>
    %c0_36 = arith.constant 0 : index
    %c0_37 = arith.constant 0 : index
    %c0_38 = arith.constant 0 : index
    %27 = vector.load %arg21[%c0_36, %c0_37, %c0_38] : memref<2x5x32xf32, #tpu.memory_space<vmem>>, vector<1x5x32xf32>
    %28 = vector.shape_cast %27 : vector<1x5x32xf32> to vector<5x32xf32>
    %cst = arith.constant dense<0.000000e+00> : vector<5xf32>
    %29 = vector.multi_reduction <add>, %28, %cst [1] : vector<5x32xf32> to vector<5xf32>
    %30 = vector.shape_cast %29 : vector<5xf32> to vector<5x1xf32>
    %cst_39 = arith.constant 3.200000e+01 : f32
    %31 = vector.broadcast %cst_39 : f32 to vector<5x1xf32>
    %32 = arith.divf %30, %31 : vector<5x1xf32>
    %33 = vector.broadcast %32 : vector<5x1xf32> to vector<5x32xf32>
    %34 = arith.subf %28, %33 : vector<5x32xf32>
    %35 = arith.mulf %34, %34 : vector<5x32xf32>
    %cst_40 = arith.constant dense<0.000000e+00> : vector<5xf32>
    %36 = vector.multi_reduction <add>, %35, %cst_40 [1] : vector<5x32xf32> to vector<5xf32>
    %37 = vector.shape_cast %36 : vector<5xf32> to vector<5x1xf32>
    %cst_41 = arith.constant 3.200000e+01 : f32
    %38 = vector.broadcast %cst_41 : f32 to vector<5x1xf32>
    %39 = arith.divf %37, %38 : vector<5x1xf32>
    %40 = vector.broadcast %32 : vector<5x1xf32> to vector<5x32xf32>
    %41 = arith.subf %28, %40 : vector<5x32xf32>
    %cst_42 = arith.constant 9.99999974E-6 : f32
    %42 = vector.broadcast %cst_42 : f32 to vector<5x1xf32>
    %43 = arith.addf %39, %42 : vector<5x1xf32>
    %44 = math.rsqrt %43 : vector<5x1xf32>
    %45 = vector.broadcast %44 : vector<5x1xf32> to vector<5x32xf32>
    %46 = arith.mulf %41, %45 : vector<5x32xf32>
    %47 = vector.broadcast %4 : vector<1x32xf32> to vector<5x32xf32>
    %48 = arith.mulf %46, %47 : vector<5x32xf32>
    %49 = vector.broadcast %6 : vector<1x32xf32> to vector<5x32xf32>
    %50 = arith.addf %48, %49 : vector<5x32xf32>
    %51 = arith.truncf %50 : vector<5x32xf32> to vector<5x32xbf16>
    %cst_43 = arith.constant dense<0.000000e+00> : vector<5x96xf32>
    %52 = tpu.matmul %51, %8, %cst_43 {dimension_numbers = #tpu.dot_dimension_numbers<[1], [0], [0], [1], [0, 0, 1, 1], [], []>} : vector<5x32xbf16>, vector<32x96xbf16>, vector<5x96xf32> -> vector<5x96xf32>
    %53 = vector.broadcast %10 : vector<1x96xf32> to vector<5x96xf32>
    %54 = arith.addf %52, %53 : vector<5x96xf32>
    %55 = vector.extract_strided_slice %54 {offsets = [0, 0], sizes = [5, 32], strides = [1, 1]} : vector<5x96xf32> to vector<5x32xf32>
    %cst_44 = arith.constant 0.353553385 : f32
    %56 = vector.broadcast %cst_44 : f32 to vector<5x32xf32>
    %57 = arith.mulf %55, %56 : vector<5x32xf32>
    %58 = arith.truncf %57 : vector<5x32xf32> to vector<5x32xbf16>
    %59 = vector.extract_strided_slice %54 {offsets = [0, 32], sizes = [5, 32], strides = [1, 1]} : vector<5x96xf32> to vector<5x32xf32>
    %60 = arith.truncf %59 : vector<5x32xf32> to vector<5x32xbf16>
    %61 = vector.extract_strided_slice %54 {offsets = [0, 64], sizes = [5, 32], strides = [1, 1]} : vector<5x96xf32> to vector<5x32xf32>
    %62 = arith.truncf %61 : vector<5x32xf32> to vector<5x32xbf16>
    %63 = vector.extract_strided_slice %58 {offsets = [0, 0], sizes = [5, 8], strides = [1, 1]} : vector<5x32xbf16> to vector<5x8xbf16>
    %64 = vector.extract_strided_slice %60 {offsets = [0, 0], sizes = [5, 8], strides = [1, 1]} : vector<5x32xbf16> to vector<5x8xbf16>
    %65 = vector.extract_strided_slice %62 {offsets = [0, 0], sizes = [5, 8], strides = [1, 1]} : vector<5x32xbf16> to vector<5x8xbf16>
    %cst_45 = arith.constant dense<0.000000e+00> : vector<5x5xf32>
    %66 = tpu.matmul %63, %64, %cst_45 {dimension_numbers = #tpu.dot_dimension_numbers<[1], [1], [0], [0], [0, 0, 1, 0], [], []>} : vector<5x8xbf16>, vector<5x8xbf16>, vector<5x5xf32> -> vector<5x5xf32>
    %cst_46 = arith.constant dense<0xFF800000> : vector<5xf32>
    %67 = vector.multi_reduction <maximumf>, %66, %cst_46 [1] : vector<5x5xf32> to vector<5xf32>
    %68 = vector.shape_cast %67 : vector<5xf32> to vector<5x1xf32>
    %69 = vector.broadcast %68 : vector<5x1xf32> to vector<5x5xf32>
    %70 = arith.subf %66, %69 : vector<5x5xf32>
    %71 = math.exp %70 : vector<5x5xf32>
    %cst_47 = arith.constant dense<0.000000e+00> : vector<5xf32>
    %72 = vector.multi_reduction <add>, %71, %cst_47 [1] : vector<5x5xf32> to vector<5xf32>
    %73 = vector.shape_cast %72 : vector<5xf32> to vector<5x1xf32>
    %74 = tpu.reciprocal %73 {approx = true} : vector<5x1xf32> -> vector<5x1xf32>
    %75 = vector.broadcast %74 : vector<5x1xf32> to vector<5x5xf32>
    %76 = arith.mulf %71, %75 : vector<5x5xf32>
    %77 = arith.truncf %76 : vector<5x5xf32> to vector<5x5xbf16>
    %cst_48 = arith.constant dense<0.000000e+00> : vector<5x8xf32>
    %78 = tpu.matmul %77, %65, %cst_48 {dimension_numbers = #tpu.dot_dimension_numbers<[1], [0], [0], [1], [0, 0, 1, 1], [], []>} : vector<5x5xbf16>, vector<5x8xbf16>, vector<5x8xf32> -> vector<5x8xf32>
    %c0_49 = arith.constant 0 : index
    %c0_50 = arith.constant 0 : index
    %79 = vector.load %arg23[%c0_49, %c0_50] : memref<5x32xf32, #tpu.memory_space<vmem>>, vector<5x8xf32>
    tpu.vector_store %arg23[%c0_49, %c0_50], %78 {strides = array<i32>} : memref<5x32xf32, #tpu.memory_space<vmem>>, vector<5x8xf32>,
    %80 = vector.extract_strided_slice %58 {offsets = [0, 8], sizes = [5, 8], strides = [1, 1]} : vector<5x32xbf16> to vector<5x8xbf16>
    %81 = vector.extract_strided_slice %60 {offsets = [0, 8], sizes = [5, 8], strides = [1, 1]} : vector<5x32xbf16> to vector<5x8xbf16>
    %82 = vector.extract_strided_slice %62 {offsets = [0, 8], sizes = [5, 8], strides = [1, 1]} : vector<5x32xbf16> to vector<5x8xbf16>
    %cst_51 = arith.constant dense<0.000000e+00> : vector<5x5xf32>
    %83 = tpu.matmul %80, %81, %cst_51 {dimension_numbers = #tpu.dot_dimension_numbers<[1], [1], [0], [0], [0, 0, 1, 0], [], []>} : vector<5x8xbf16>, vector<5x8xbf16>, vector<5x5xf32> -> vector<5x5xf32>
    %cst_52 = arith.constant dense<0xFF800000> : vector<5xf32>
    %84 = vector.multi_reduction <maximumf>, %83, %cst_52 [1] : vector<5x5xf32> to vector<5xf32>
    %85 = vector.shape_cast %84 : vector<5xf32> to vector<5x1xf32>
    %86 = vector.broadcast %85 : vector<5x1xf32> to vector<5x5xf32>
    %87 = arith.subf %83, %86 : vector<5x5xf32>
    %88 = math.exp %87 : vector<5x5xf32>
    %cst_53 = arith.constant dense<0.000000e+00> : vector<5xf32>
    %89 = vector.multi_reduction <add>, %88, %cst_53 [1] : vector<5x5xf32> to vector<5xf32>
    %90 = vector.shape_cast %89 : vector<5xf32> to vector<5x1xf32>
    %91 = tpu.reciprocal %90 {approx = true} : vector<5x1xf32> -> vector<5x1xf32>
    %92 = vector.broadcast %91 : vector<5x1xf32> to vector<5x5xf32>
    %93 = arith.mulf %88, %92 : vector<5x5xf32>
    %94 = arith.truncf %93 : vector<5x5xf32> to vector<5x5xbf16>
    %cst_54 = arith.constant dense<0.000000e+00> : vector<5x8xf32>
    %95 = tpu.matmul %94, %82, %cst_54 {dimension_numbers = #tpu.dot_dimension_numbers<[1], [0], [0], [1], [0, 0, 1, 1], [], []>} : vector<5x5xbf16>, vector<5x8xbf16>, vector<5x8xf32> -> vector<5x8xf32>
    %c0_55 = arith.constant 0 : index
    %c8 = arith.constant 8 : index
    %96 = vector.load %arg23[%c0_55, %c8] : memref<5x32xf32, #tpu.memory_space<vmem>>, vector<5x8xf32>
    tpu.vector_store %arg23[%c0_55, %c8], %95 {strides = array<i32>} : memref<5x32xf32, #tpu.memory_space<vmem>>, vector<5x8xf32>,
    %97 = vector.extract_strided_slice %58 {offsets = [0, 16], sizes = [5, 8], strides = [1, 1]} : vector<5x32xbf16> to vector<5x8xbf16>
    %98 = vector.extract_strided_slice %60 {offsets = [0, 16], sizes = [5, 8], strides = [1, 1]} : vector<5x32xbf16> to vector<5x8xbf16>
    %99 = vector.extract_strided_slice %62 {offsets = [0, 16], sizes = [5, 8], strides = [1, 1]} : vector<5x32xbf16> to vector<5x8xbf16>
    %cst_56 = arith.constant dense<0.000000e+00> : vector<5x5xf32>
    %100 = tpu.matmul %97, %98, %cst_56 {dimension_numbers = #tpu.dot_dimension_numbers<[1], [1], [0], [0], [0, 0, 1, 0], [], []>} : vector<5x8xbf16>, vector<5x8xbf16>, vector<5x5xf32> -> vector<5x5xf32>
    %cst_57 = arith.constant dense<0xFF800000> : vector<5xf32>
    %101 = vector.multi_reduction <maximumf>, %100, %cst_57 [1] : vector<5x5xf32> to vector<5xf32>
    %102 = vector.shape_cast %101 : vector<5xf32> to vector<5x1xf32>
    %103 = vector.broadcast %102 : vector<5x1xf32> to vector<5x5xf32>
    %104 = arith.subf %100, %103 : vector<5x5xf32>
    %105 = math.exp %104 : vector<5x5xf32>
    %cst_58 = arith.constant dense<0.000000e+00> : vector<5xf32>
    %106 = vector.multi_reduction <add>, %105, %cst_58 [1] : vector<5x5xf32> to vector<5xf32>
    %107 = vector.shape_cast %106 : vector<5xf32> to vector<5x1xf32>
    %108 = tpu.reciprocal %107 {approx = true} : vector<5x1xf32> -> vector<5x1xf32>
    %109 = vector.broadcast %108 : vector<5x1xf32> to vector<5x5xf32>
    %110 = arith.mulf %105, %109 : vector<5x5xf32>
    %111 = arith.truncf %110 : vector<5x5xf32> to vector<5x5xbf16>
    %cst_59 = arith.constant dense<0.000000e+00> : vector<5x8xf32>
    %112 = tpu.matmul %111, %99, %cst_59 {dimension_numbers = #tpu.dot_dimension_numbers<[1], [0], [0], [1], [0, 0, 1, 1], [], []>} : vector<5x5xbf16>, vector<5x8xbf16>, vector<5x8xf32> -> vector<5x8xf32>
    %c0_60 = arith.constant 0 : index
    %c16 = arith.constant 16 : index
    %113 = vector.load %arg23[%c0_60, %c16] : memref<5x32xf32, #tpu.memory_space<vmem>>, vector<5x8xf32>
    tpu.vector_store %arg23[%c0_60, %c16], %112 {strides = array<i32>} : memref<5x32xf32, #tpu.memory_space<vmem>>, vector<5x8xf32>,
    %114 = vector.extract_strided_slice %58 {offsets = [0, 24], sizes = [5, 8], strides = [1, 1]} : vector<5x32xbf16> to vector<5x8xbf16>
    %115 = vector.extract_strided_slice %60 {offsets = [0, 24], sizes = [5, 8], strides = [1, 1]} : vector<5x32xbf16> to vector<5x8xbf16>
    %116 = vector.extract_strided_slice %62 {offsets = [0, 24], sizes = [5, 8], strides = [1, 1]} : vector<5x32xbf16> to vector<5x8xbf16>
    %cst_61 = arith.constant dense<0.000000e+00> : vector<5x5xf32>
    %117 = tpu.matmul %114, %115, %cst_61 {dimension_numbers = #tpu.dot_dimension_numbers<[1], [1], [0], [0], [0, 0, 1, 0], [], []>} : vector<5x8xbf16>, vector<5x8xbf16>, vector<5x5xf32> -> vector<5x5xf32>
    %cst_62 = arith.constant dense<0xFF800000> : vector<5xf32>
    %118 = vector.multi_reduction <maximumf>, %117, %cst_62 [1] : vector<5x5xf32> to vector<5xf32>
    %119 = vector.shape_cast %118 : vector<5xf32> to vector<5x1xf32>
    %120 = vector.broadcast %119 : vector<5x1xf32> to vector<5x5xf32>
    %121 = arith.subf %117, %120 : vector<5x5xf32>
    %122 = math.exp %121 : vector<5x5xf32>
    %cst_63 = arith.constant dense<0.000000e+00> : vector<5xf32>
    %123 = vector.multi_reduction <add>, %122, %cst_63 [1] : vector<5x5xf32> to vector<5xf32>
    %124 = vector.shape_cast %123 : vector<5xf32> to vector<5x1xf32>
    %125 = tpu.reciprocal %124 {approx = true} : vector<5x1xf32> -> vector<5x1xf32>
    %126 = vector.broadcast %125 : vector<5x1xf32> to vector<5x5xf32>
    %127 = arith.mulf %122, %126 : vector<5x5xf32>
    %128 = arith.truncf %127 : vector<5x5xf32> to vector<5x5xbf16>
    %cst_64 = arith.constant dense<0.000000e+00> : vector<5x8xf32>
    %129 = tpu.matmul %128, %116, %cst_64 {dimension_numbers = #tpu.dot_dimension_numbers<[1], [0], [0], [1], [0, 0, 1, 1], [], []>} : vector<5x5xbf16>, vector<5x8xbf16>, vector<5x8xf32> -> vector<5x8xf32>
    %c0_65 = arith.constant 0 : index
    %c24 = arith.constant 24 : index
    %130 = vector.load %arg23[%c0_65, %c24] : memref<5x32xf32, #tpu.memory_space<vmem>>, vector<5x8xf32>
    tpu.vector_store %arg23[%c0_65, %c24], %129 {strides = array<i32>} : memref<5x32xf32, #tpu.memory_space<vmem>>, vector<5x8xf32>,
    %c0_66 = arith.constant 0 : index
    %c0_67 = arith.constant 0 : index
    %131 = vector.load %arg23[%c0_66, %c0_67] : memref<5x32xf32, #tpu.memory_space<vmem>>, vector<5x32xf32>
    %132 = arith.truncf %131 : vector<5x32xf32> to vector<5x32xbf16>
    %cst_68 = arith.constant dense<0.000000e+00> : vector<5x32xf32>
    %133 = tpu.matmul %132, %12, %cst_68 {dimension_numbers = #tpu.dot_dimension_numbers<[1], [0], [0], [1], [0, 0, 1, 1], [], []>} : vector<5x32xbf16>, vector<32x32xbf16>, vector<5x32xf32> -> vector<5x32xf32>
    %134 = vector.broadcast %14 : vector<1x32xf32> to vector<5x32xf32>
    %135 = arith.addf %133, %134 : vector<5x32xf32>
    %136 = arith.addf %28, %135 : vector<5x32xf32>
    %cst_69 = arith.constant dense<0.000000e+00> : vector<5xf32>
    %137 = vector.multi_reduction <add>, %136, %cst_69 [1] : vector<5x32xf32> to vector<5xf32>
    %138 = vector.shape_cast %137 : vector<5xf32> to vector<5x1xf32>
    %cst_70 = arith.constant 3.200000e+01 : f32
    %139 = vector.broadcast %cst_70 : f32 to vector<5x1xf32>
    %140 = arith.divf %138, %139 : vector<5x1xf32>
    %141 = vector.broadcast %140 : vector<5x1xf32> to vector<5x32xf32>
    %142 = arith.subf %136, %141 : vector<5x32xf32>
    %143 = arith.mulf %142, %142 : vector<5x32xf32>
    %cst_71 = arith.constant dense<0.000000e+00> : vector<5xf32>
    %144 = vector.multi_reduction <add>, %143, %cst_71 [1] : vector<5x32xf32> to vector<5xf32>
    %145 = vector.shape_cast %144 : vector<5xf32> to vector<5x1xf32>
    %cst_72 = arith.constant 3.200000e+01 : f32
    %146 = vector.broadcast %cst_72 : f32 to vector<5x1xf32>
    %147 = arith.divf %145, %146 : vector<5x1xf32>
    %148 = vector.broadcast %140 : vector<5x1xf32> to vector<5x32xf32>
    %149 = arith.subf %136, %148 : vector<5x32xf32>
    %cst_73 = arith.constant 9.99999974E-6 : f32
    %150 = vector.broadcast %cst_73 : f32 to vector<5x1xf32>
    %151 = arith.addf %147, %150 : vector<5x1xf32>
    %152 = math.rsqrt %151 : vector<5x1xf32>
    %153 = vector.broadcast %152 : vector<5x1xf32> to vector<5x32xf32>
    %154 = arith.mulf %149, %153 : vector<5x32xf32>
    %155 = vector.broadcast %16 : vector<1x32xf32> to vector<5x32xf32>
    %156 = arith.mulf %154, %155 : vector<5x32xf32>
    %157 = vector.broadcast %18 : vector<1x32xf32> to vector<5x32xf32>
    %158 = arith.addf %156, %157 : vector<5x32xf32>
    %159 = arith.truncf %158 : vector<5x32xf32> to vector<5x32xbf16>
    %cst_74 = arith.constant dense<0.000000e+00> : vector<5x128xf32>
    %160 = tpu.matmul %159, %20, %cst_74 {dimension_numbers = #tpu.dot_dimension_numbers<[1], [0], [0], [1], [0, 0, 1, 1], [], []>} : vector<5x32xbf16>, vector<32x128xbf16>, vector<5x128xf32> -> vector<5x128xf32>
    %161 = vector.broadcast %22 : vector<1x128xf32> to vector<5x128xf32>
    %162 = arith.addf %160, %161 : vector<5x128xf32>
    %cst_75 = arith.constant 1.702000e+00 : f32
    %163 = vector.broadcast %cst_75 : f32 to vector<5x128xf32>
    %164 = arith.mulf %163, %162 : vector<5x128xf32>
    %165 = arith.negf %164 : vector<5x128xf32>
    %166 = math.exp %165 : vector<5x128xf32>
    %cst_76 = arith.constant 1.000000e+00 : f32
    %167 = vector.broadcast %cst_76 : f32 to vector<5x128xf32>
    %168 = arith.addf %167, %166 : vector<5x128xf32>
    %169 = arith.divf %167, %168 : vector<5x128xf32>
    %170 = arith.mulf %162, %169 : vector<5x128xf32>
    %171 = arith.truncf %170 : vector<5x128xf32> to vector<5x128xbf16>
    %cst_77 = arith.constant dense<0.000000e+00> : vector<5x32xf32>
    %172 = tpu.matmul %171, %24, %cst_77 {dimension_numbers = #tpu.dot_dimension_numbers<[1], [0], [0], [1], [0, 0, 1, 1], [], []>} : vector<5x128xbf16>, vector<128x32xbf16>, vector<5x32xf32> -> vector<5x32xf32>
    %173 = vector.broadcast %26 : vector<1x32xf32> to vector<5x32xf32>
    %174 = arith.addf %172, %173 : vector<5x32xf32>
    %175 = arith.addf %136, %174 : vector<5x32xf32>
    %c0_78 = arith.constant 0 : index
    %c0_79 = arith.constant 0 : index
    %c0_80 = arith.constant 0 : index
    %176 = vector.load %arg21[%c0_78, %c0_79, %c0_80] : memref<2x5x32xf32, #tpu.memory_space<vmem>>, vector<1x5x32xf32>
    %177 = vector.shape_cast %176 : vector<1x5x32xf32> to vector<5x32xf32>
    %178 = vector.shape_cast %175 : vector<5x32xf32> to vector<1x5x32xf32>
    tpu.vector_store %arg21[%c0_78, %c0_79, %c0_80], %178 {strides = array<i32>} : memref<2x5x32xf32, #tpu.memory_space<vmem>>, vector<1x5x32xf32>,
    %179 = vector.extract_strided_slice %175 {offsets = [0, 0], sizes = [1, 32], strides = [1, 1]} : vector<5x32xf32> to vector<1x32xf32>
    %c0_81 = arith.constant 0 : index
    %c0_82 = arith.constant 0 : index
    %180 = vector.load %arg22[%c0_81, %c0_82] : memref<2x32xf32, #tpu.memory_space<vmem>>, vector<1x32xf32>
    tpu.vector_store %arg22[%c0_81, %c0_82], %179 {strides = array<i32>} : memref<2x32xf32, #tpu.memory_space<vmem>>, vector<1x32xf32>,
    %c1 = arith.constant 1 : index
    %c0_83 = arith.constant 0 : index
    %c0_84 = arith.constant 0 : index
    %181 = vector.load %arg21[%c1, %c0_83, %c0_84] : memref<2x5x32xf32, #tpu.memory_space<vmem>>, vector<1x5x32xf32>
    %182 = vector.shape_cast %181 : vector<1x5x32xf32> to vector<5x32xf32>
    %cst_85 = arith.constant dense<0.000000e+00> : vector<5xf32>
    %183 = vector.multi_reduction <add>, %182, %cst_85 [1] : vector<5x32xf32> to vector<5xf32>
    %184 = vector.shape_cast %183 : vector<5xf32> to vector<5x1xf32>
    %cst_86 = arith.constant 3.200000e+01 : f32
    %185 = vector.broadcast %cst_86 : f32 to vector<5x1xf32>
    %186 = arith.divf %184, %185 : vector<5x1xf32>
    %187 = vector.broadcast %186 : vector<5x1xf32> to vector<5x32xf32>
    %188 = arith.subf %182, %187 : vector<5x32xf32>
    %189 = arith.mulf %188, %188 : vector<5x32xf32>
    %cst_87 = arith.constant dense<0.000000e+00> : vector<5xf32>
    %190 = vector.multi_reduction <add>, %189, %cst_87 [1] : vector<5x32xf32> to vector<5xf32>
    %191 = vector.shape_cast %190 : vector<5xf32> to vector<5x1xf32>
    %cst_88 = arith.constant 3.200000e+01 : f32
    %192 = vector.broadcast %cst_88 : f32 to vector<5x1xf32>
    %193 = arith.divf %191, %192 : vector<5x1xf32>
    %194 = vector.broadcast %186 : vector<5x1xf32> to vector<5x32xf32>
    %195 = arith.subf %182, %194 : vector<5x32xf32>
    %cst_89 = arith.constant 9.99999974E-6 : f32
    %196 = vector.broadcast %cst_89 : f32 to vector<5x1xf32>
    %197 = arith.addf %193, %196 : vector<5x1xf32>
    %198 = math.rsqrt %197 : vector<5x1xf32>
    %199 = vector.broadcast %198 : vector<5x1xf32> to vector<5x32xf32>
    %200 = arith.mulf %195, %199 : vector<5x32xf32>
    %201 = vector.broadcast %4 : vector<1x32xf32> to vector<5x32xf32>
    %202 = arith.mulf %200, %201 : vector<5x32xf32>
    %203 = vector.broadcast %6 : vector<1x32xf32> to vector<5x32xf32>
    %204 = arith.addf %202, %203 : vector<5x32xf32>
    %205 = arith.truncf %204 : vector<5x32xf32> to vector<5x32xbf16>
    %cst_90 = arith.constant dense<0.000000e+00> : vector<5x96xf32>
    %206 = tpu.matmul %205, %8, %cst_90 {dimension_numbers = #tpu.dot_dimension_numbers<[1], [0], [0], [1], [0, 0, 1, 1], [], []>} : vector<5x32xbf16>, vector<32x96xbf16>, vector<5x96xf32> -> vector<5x96xf32>
    %207 = vector.broadcast %10 : vector<1x96xf32> to vector<5x96xf32>
    %208 = arith.addf %206, %207 : vector<5x96xf32>
    %209 = vector.extract_strided_slice %208 {offsets = [0, 0], sizes = [5, 32], strides = [1, 1]} : vector<5x96xf32> to vector<5x32xf32>
    %cst_91 = arith.constant 0.353553385 : f32
    %210 = vector.broadcast %cst_91 : f32 to vector<5x32xf32>
    %211 = arith.mulf %209, %210 : vector<5x32xf32>
    %212 = arith.truncf %211 : vector<5x32xf32> to vector<5x32xbf16>
    %213 = vector.extract_strided_slice %208 {offsets = [0, 32], sizes = [5, 32], strides = [1, 1]} : vector<5x96xf32> to vector<5x32xf32>
    %214 = arith.truncf %213 : vector<5x32xf32> to vector<5x32xbf16>
    %215 = vector.extract_strided_slice %208 {offsets = [0, 64], sizes = [5, 32], strides = [1, 1]} : vector<5x96xf32> to vector<5x32xf32>
    %216 = arith.truncf %215 : vector<5x32xf32> to vector<5x32xbf16>
    %217 = vector.extract_strided_slice %212 {offsets = [0, 0], sizes = [5, 8], strides = [1, 1]} : vector<5x32xbf16> to vector<5x8xbf16>
    %218 = vector.extract_strided_slice %214 {offsets = [0, 0], sizes = [5, 8], strides = [1, 1]} : vector<5x32xbf16> to vector<5x8xbf16>
    %219 = vector.extract_strided_slice %216 {offsets = [0, 0], sizes = [5, 8], strides = [1, 1]} : vector<5x32xbf16> to vector<5x8xbf16>
    %cst_92 = arith.constant dense<0.000000e+00> : vector<5x5xf32>
    %220 = tpu.matmul %217, %218, %cst_92 {dimension_numbers = #tpu.dot_dimension_numbers<[1], [1], [0], [0], [0, 0, 1, 0], [], []>} : vector<5x8xbf16>, vector<5x8xbf16>, vector<5x5xf32> -> vector<5x5xf32>
    %cst_93 = arith.constant dense<0xFF800000> : vector<5xf32>
    %221 = vector.multi_reduction <maximumf>, %220, %cst_93 [1] : vector<5x5xf32> to vector<5xf32>
    %222 = vector.shape_cast %221 : vector<5xf32> to vector<5x1xf32>
    %223 = vector.broadcast %222 : vector<5x1xf32> to vector<5x5xf32>
    %224 = arith.subf %220, %223 : vector<5x5xf32>
    %225 = math.exp %224 : vector<5x5xf32>
    %cst_94 = arith.constant dense<0.000000e+00> : vector<5xf32>
    %226 = vector.multi_reduction <add>, %225, %cst_94 [1] : vector<5x5xf32> to vector<5xf32>
    %227 = vector.shape_cast %226 : vector<5xf32> to vector<5x1xf32>
    %228 = tpu.reciprocal %227 {approx = true} : vector<5x1xf32> -> vector<5x1xf32>
    %229 = vector.broadcast %228 : vector<5x1xf32> to vector<5x5xf32>
    %230 = arith.mulf %225, %229 : vector<5x5xf32>
    %231 = arith.truncf %230 : vector<5x5xf32> to vector<5x5xbf16>
    %cst_95 = arith.constant dense<0.000000e+00> : vector<5x8xf32>
    %232 = tpu.matmul %231, %219, %cst_95 {dimension_numbers = #tpu.dot_dimension_numbers<[1], [0], [0], [1], [0, 0, 1, 1], [], []>} : vector<5x5xbf16>, vector<5x8xbf16>, vector<5x8xf32> -> vector<5x8xf32>
    %c0_96 = arith.constant 0 : index
    %c0_97 = arith.constant 0 : index
    %233 = vector.load %arg23[%c0_96, %c0_97] : memref<5x32xf32, #tpu.memory_space<vmem>>, vector<5x8xf32>
    tpu.vector_store %arg23[%c0_96, %c0_97], %232 {strides = array<i32>} : memref<5x32xf32, #tpu.memory_space<vmem>>, vector<5x8xf32>,
    %234 = vector.extract_strided_slice %212 {offsets = [0, 8], sizes = [5, 8], strides = [1, 1]} : vector<5x32xbf16> to vector<5x8xbf16>
    %235 = vector.extract_strided_slice %214 {offsets = [0, 8], sizes = [5, 8], strides = [1, 1]} : vector<5x32xbf16> to vector<5x8xbf16>
    %236 = vector.extract_strided_slice %216 {offsets = [0, 8], sizes = [5, 8], strides = [1, 1]} : vector<5x32xbf16> to vector<5x8xbf16>
    %cst_98 = arith.constant dense<0.000000e+00> : vector<5x5xf32>
    %237 = tpu.matmul %234, %235, %cst_98 {dimension_numbers = #tpu.dot_dimension_numbers<[1], [1], [0], [0], [0, 0, 1, 0], [], []>} : vector<5x8xbf16>, vector<5x8xbf16>, vector<5x5xf32> -> vector<5x5xf32>
    %cst_99 = arith.constant dense<0xFF800000> : vector<5xf32>
    %238 = vector.multi_reduction <maximumf>, %237, %cst_99 [1] : vector<5x5xf32> to vector<5xf32>
    %239 = vector.shape_cast %238 : vector<5xf32> to vector<5x1xf32>
    %240 = vector.broadcast %239 : vector<5x1xf32> to vector<5x5xf32>
    %241 = arith.subf %237, %240 : vector<5x5xf32>
    %242 = math.exp %241 : vector<5x5xf32>
    %cst_100 = arith.constant dense<0.000000e+00> : vector<5xf32>
    %243 = vector.multi_reduction <add>, %242, %cst_100 [1] : vector<5x5xf32> to vector<5xf32>
    %244 = vector.shape_cast %243 : vector<5xf32> to vector<5x1xf32>
    %245 = tpu.reciprocal %244 {approx = true} : vector<5x1xf32> -> vector<5x1xf32>
    %246 = vector.broadcast %245 : vector<5x1xf32> to vector<5x5xf32>
    %247 = arith.mulf %242, %246 : vector<5x5xf32>
    %248 = arith.truncf %247 : vector<5x5xf32> to vector<5x5xbf16>
    %cst_101 = arith.constant dense<0.000000e+00> : vector<5x8xf32>
    %249 = tpu.matmul %248, %236, %cst_101 {dimension_numbers = #tpu.dot_dimension_numbers<[1], [0], [0], [1], [0, 0, 1, 1], [], []>} : vector<5x5xbf16>, vector<5x8xbf16>, vector<5x8xf32> -> vector<5x8xf32>
    %c0_102 = arith.constant 0 : index
    %c8_103 = arith.constant 8 : index
    %250 = vector.load %arg23[%c0_102, %c8_103] : memref<5x32xf32, #tpu.memory_space<vmem>>, vector<5x8xf32>
    tpu.vector_store %arg23[%c0_102, %c8_103], %249 {strides = array<i32>} : memref<5x32xf32, #tpu.memory_space<vmem>>, vector<5x8xf32>,
    %251 = vector.extract_strided_slice %212 {offsets = [0, 16], sizes = [5, 8], strides = [1, 1]} : vector<5x32xbf16> to vector<5x8xbf16>
    %252 = vector.extract_strided_slice %214 {offsets = [0, 16], sizes = [5, 8], strides = [1, 1]} : vector<5x32xbf16> to vector<5x8xbf16>
    %253 = vector.extract_strided_slice %216 {offsets = [0, 16], sizes = [5, 8], strides = [1, 1]} : vector<5x32xbf16> to vector<5x8xbf16>
    %cst_104 = arith.constant dense<0.000000e+00> : vector<5x5xf32>
    %254 = tpu.matmul %251, %252, %cst_104 {dimension_numbers = #tpu.dot_dimension_numbers<[1], [1], [0], [0], [0, 0, 1, 0], [], []>} : vector<5x8xbf16>, vector<5x8xbf16>, vector<5x5xf32> -> vector<5x5xf32>
    %cst_105 = arith.constant dense<0xFF800000> : vector<5xf32>
    %255 = vector.multi_reduction <maximumf>, %254, %cst_105 [1] : vector<5x5xf32> to vector<5xf32>
    %256 = vector.shape_cast %255 : vector<5xf32> to vector<5x1xf32>
    %257 = vector.broadcast %256 : vector<5x1xf32> to vector<5x5xf32>
    %258 = arith.subf %254, %257 : vector<5x5xf32>
    %259 = math.exp %258 : vector<5x5xf32>
    %cst_106 = arith.constant dense<0.000000e+00> : vector<5xf32>
    %260 = vector.multi_reduction <add>, %259, %cst_106 [1] : vector<5x5xf32> to vector<5xf32>
    %261 = vector.shape_cast %260 : vector<5xf32> to vector<5x1xf32>
    %262 = tpu.reciprocal %261 {approx = true} : vector<5x1xf32> -> vector<5x1xf32>
    %263 = vector.broadcast %262 : vector<5x1xf32> to vector<5x5xf32>
    %264 = arith.mulf %259, %263 : vector<5x5xf32>
    %265 = arith.truncf %264 : vector<5x5xf32> to vector<5x5xbf16>
    %cst_107 = arith.constant dense<0.000000e+00> : vector<5x8xf32>
    %266 = tpu.matmul %265, %253, %cst_107 {dimension_numbers = #tpu.dot_dimension_numbers<[1], [0], [0], [1], [0, 0, 1, 1], [], []>} : vector<5x5xbf16>, vector<5x8xbf16>, vector<5x8xf32> -> vector<5x8xf32>
    %c0_108 = arith.constant 0 : index
    %c16_109 = arith.constant 16 : index
    %267 = vector.load %arg23[%c0_108, %c16_109] : memref<5x32xf32, #tpu.memory_space<vmem>>, vector<5x8xf32>
    tpu.vector_store %arg23[%c0_108, %c16_109], %266 {strides = array<i32>} : memref<5x32xf32, #tpu.memory_space<vmem>>, vector<5x8xf32>,
    %268 = vector.extract_strided_slice %212 {offsets = [0, 24], sizes = [5, 8], strides = [1, 1]} : vector<5x32xbf16> to vector<5x8xbf16>
    %269 = vector.extract_strided_slice %214 {offsets = [0, 24], sizes = [5, 8], strides = [1, 1]} : vector<5x32xbf16> to vector<5x8xbf16>
    %270 = vector.extract_strided_slice %216 {offsets = [0, 24], sizes = [5, 8], strides = [1, 1]} : vector<5x32xbf16> to vector<5x8xbf16>
    %cst_110 = arith.constant dense<0.000000e+00> : vector<5x5xf32>
    %271 = tpu.matmul %268, %269, %cst_110 {dimension_numbers = #tpu.dot_dimension_numbers<[1], [1], [0], [0], [0, 0, 1, 0], [], []>} : vector<5x8xbf16>, vector<5x8xbf16>, vector<5x5xf32> -> vector<5x5xf32>
    %cst_111 = arith.constant dense<0xFF800000> : vector<5xf32>
    %272 = vector.multi_reduction <maximumf>, %271, %cst_111 [1] : vector<5x5xf32> to vector<5xf32>
    %273 = vector.shape_cast %272 : vector<5xf32> to vector<5x1xf32>
    %274 = vector.broadcast %273 : vector<5x1xf32> to vector<5x5xf32>
    %275 = arith.subf %271, %274 : vector<5x5xf32>
    %276 = math.exp %275 : vector<5x5xf32>
    %cst_112 = arith.constant dense<0.000000e+00> : vector<5xf32>
    %277 = vector.multi_reduction <add>, %276, %cst_112 [1] : vector<5x5xf32> to vector<5xf32>
    %278 = vector.shape_cast %277 : vector<5xf32> to vector<5x1xf32>
    %279 = tpu.reciprocal %278 {approx = true} : vector<5x1xf32> -> vector<5x1xf32>
    %280 = vector.broadcast %279 : vector<5x1xf32> to vector<5x5xf32>
    %281 = arith.mulf %276, %280 : vector<5x5xf32>
    %282 = arith.truncf %281 : vector<5x5xf32> to vector<5x5xbf16>
    %cst_113 = arith.constant dense<0.000000e+00> : vector<5x8xf32>
    %283 = tpu.matmul %282, %270, %cst_113 {dimension_numbers = #tpu.dot_dimension_numbers<[1], [0], [0], [1], [0, 0, 1, 1], [], []>} : vector<5x5xbf16>, vector<5x8xbf16>, vector<5x8xf32> -> vector<5x8xf32>
    %c0_114 = arith.constant 0 : index
    %c24_115 = arith.constant 24 : index
    %284 = vector.load %arg23[%c0_114, %c24_115] : memref<5x32xf32, #tpu.memory_space<vmem>>, vector<5x8xf32>
    tpu.vector_store %arg23[%c0_114, %c24_115], %283 {strides = array<i32>} : memref<5x32xf32, #tpu.memory_space<vmem>>, vector<5x8xf32>,
    %c0_116 = arith.constant 0 : index
    %c0_117 = arith.constant 0 : index
    %285 = vector.load %arg23[%c0_116, %c0_117] : memref<5x32xf32, #tpu.memory_space<vmem>>, vector<5x32xf32>
    %286 = arith.truncf %285 : vector<5x32xf32> to vector<5x32xbf16>
    %cst_118 = arith.constant dense<0.000000e+00> : vector<5x32xf32>
    %287 = tpu.matmul %286, %12, %cst_118 {dimension_numbers = #tpu.dot_dimension_numbers<[1], [0], [0], [1], [0, 0, 1, 1], [], []>} : vector<5x32xbf16>, vector<32x32xbf16>, vector<5x32xf32> -> vector<5x32xf32>
    %288 = vector.broadcast %14 : vector<1x32xf32> to vector<5x32xf32>
    %289 = arith.addf %287, %288 : vector<5x32xf32>
    %290 = arith.addf %182, %289 : vector<5x32xf32>
    %cst_119 = arith.constant dense<0.000000e+00> : vector<5xf32>
    %291 = vector.multi_reduction <add>, %290, %cst_119 [1] : vector<5x32xf32> to vector<5xf32>
    %292 = vector.shape_cast %291 : vector<5xf32> to vector<5x1xf32>
    %cst_120 = arith.constant 3.200000e+01 : f32
    %293 = vector.broadcast %cst_120 : f32 to vector<5x1xf32>
    %294 = arith.divf %292, %293 : vector<5x1xf32>
    %295 = vector.broadcast %294 : vector<5x1xf32> to vector<5x32xf32>
    %296 = arith.subf %290, %295 : vector<5x32xf32>
    %297 = arith.mulf %296, %296 : vector<5x32xf32>
    %cst_121 = arith.constant dense<0.000000e+00> : vector<5xf32>
    %298 = vector.multi_reduction <add>, %297, %cst_121 [1] : vector<5x32xf32> to vector<5xf32>
    %299 = vector.shape_cast %298 : vector<5xf32> to vector<5x1xf32>
    %cst_122 = arith.constant 3.200000e+01 : f32
    %300 = vector.broadcast %cst_122 : f32 to vector<5x1xf32>
    %301 = arith.divf %299, %300 : vector<5x1xf32>
    %302 = vector.broadcast %294 : vector<5x1xf32> to vector<5x32xf32>
    %303 = arith.subf %290, %302 : vector<5x32xf32>
    %cst_123 = arith.constant 9.99999974E-6 : f32
    %304 = vector.broadcast %cst_123 : f32 to vector<5x1xf32>
    %305 = arith.addf %301, %304 : vector<5x1xf32>
    %306 = math.rsqrt %305 : vector<5x1xf32>
    %307 = vector.broadcast %306 : vector<5x1xf32> to vector<5x32xf32>
    %308 = arith.mulf %303, %307 : vector<5x32xf32>
    %309 = vector.broadcast %16 : vector<1x32xf32> to vector<5x32xf32>
    %310 = arith.mulf %308, %309 : vector<5x32xf32>
    %311 = vector.broadcast %18 : vector<1x32xf32> to vector<5x32xf32>
    %312 = arith.addf %310, %311 : vector<5x32xf32>
    %313 = arith.truncf %312 : vector<5x32xf32> to vector<5x32xbf16>
    %cst_124 = arith.constant dense<0.000000e+00> : vector<5x128xf32>
    %314 = tpu.matmul %313, %20, %cst_124 {dimension_numbers = #tpu.dot_dimension_numbers<[1], [0], [0], [1], [0, 0, 1, 1], [], []>} : vector<5x32xbf16>, vector<32x128xbf16>, vector<5x128xf32> -> vector<5x128xf32>
    %315 = vector.broadcast %22 : vector<1x128xf32> to vector<5x128xf32>
    %316 = arith.addf %314, %315 : vector<5x128xf32>
    %cst_125 = arith.constant 1.702000e+00 : f32
    %317 = vector.broadcast %cst_125 : f32 to vector<5x128xf32>
    %318 = arith.mulf %317, %316 : vector<5x128xf32>
    %319 = arith.negf %318 : vector<5x128xf32>
    %320 = math.exp %319 : vector<5x128xf32>
    %cst_126 = arith.constant 1.000000e+00 : f32
    %321 = vector.broadcast %cst_126 : f32 to vector<5x128xf32>
    %322 = arith.addf %321, %320 : vector<5x128xf32>
    %323 = arith.divf %321, %322 : vector<5x128xf32>
    %324 = arith.mulf %316, %323 : vector<5x128xf32>
    %325 = arith.truncf %324 : vector<5x128xf32> to vector<5x128xbf16>
    %cst_127 = arith.constant dense<0.000000e+00> : vector<5x32xf32>
    %326 = tpu.matmul %325, %24, %cst_127 {dimension_numbers = #tpu.dot_dimension_numbers<[1], [0], [0], [1], [0, 0, 1, 1], [], []>} : vector<5x128xbf16>, vector<128x32xbf16>, vector<5x32xf32> -> vector<5x32xf32>
    %327 = vector.broadcast %26 : vector<1x32xf32> to vector<5x32xf32>
    %328 = arith.addf %326, %327 : vector<5x32xf32>
    %329 = arith.addf %290, %328 : vector<5x32xf32>
    %c1_128 = arith.constant 1 : index
    %c0_129 = arith.constant 0 : index
    %c0_130 = arith.constant 0 : index
    %330 = vector.load %arg21[%c1_128, %c0_129, %c0_130] : memref<2x5x32xf32, #tpu.memory_space<vmem>>, vector<1x5x32xf32>
    %331 = vector.shape_cast %330 : vector<1x5x32xf32> to vector<5x32xf32>
    %332 = vector.shape_cast %329 : vector<5x32xf32> to vector<1x5x32xf32>
    tpu.vector_store %arg21[%c1_128, %c0_129, %c0_130], %332 {strides = array<i32>} : memref<2x5x32xf32, #tpu.memory_space<vmem>>, vector<1x5x32xf32>,
    %333 = vector.extract_strided_slice %329 {offsets = [0, 0], sizes = [1, 32], strides = [1, 1]} : vector<5x32xf32> to vector<1x32xf32>
    %c1_131 = arith.constant 1 : index
    %c0_132 = arith.constant 0 : index
    %334 = vector.load %arg22[%c1_131, %c0_132] : memref<2x32xf32, #tpu.memory_space<vmem>>, vector<1x32xf32>
    tpu.vector_store %arg22[%c1_131, %c0_132], %333 {strides = array<i32>} : memref<2x32xf32, #tpu.memory_space<vmem>>, vector<1x32xf32>,
    %c1_i32 = arith.constant 1 : i32
    %335 = arith.cmpi eq, %arg0, %c1_i32 : i32
    %336 = arith.extui %335 : i1 to i32
    %c0_i32_133 = arith.constant 0 : i32
    %337 = arith.cmpi ne, %336, %c0_i32_133 : i32
    scf.if %337 {
      %c0_134 = arith.constant 0 : index
      %c0_135 = arith.constant 0 : index
      %338 = vector.load %arg22[%c0_134, %c0_135] : memref<2x32xf32, #tpu.memory_space<vmem>>, vector<2x32xf32>
      %c0_136 = arith.constant 0 : index
      %c0_137 = arith.constant 0 : index
      %339 = vector.load %arg17[%c0_136, %c0_137] : memref<1x32xf32, #tpu.memory_space<vmem>>, vector<1x32xf32>
      %c0_138 = arith.constant 0 : index
      %c0_139 = arith.constant 0 : index
      %340 = vector.load %arg18[%c0_138, %c0_139] : memref<1x32xf32, #tpu.memory_space<vmem>>, vector<1x32xf32>
      %cst_140 = arith.constant dense<0.000000e+00> : vector<2xf32>
      %341 = vector.multi_reduction <add>, %338, %cst_140 [1] : vector<2x32xf32> to vector<2xf32>
      %342 = vector.shape_cast %341 : vector<2xf32> to vector<2x1xf32>
      %cst_141 = arith.constant 3.200000e+01 : f32
      %343 = vector.broadcast %cst_141 : f32 to vector<2x1xf32>
      %344 = arith.divf %342, %343 : vector<2x1xf32>
      %345 = vector.broadcast %344 : vector<2x1xf32> to vector<2x32xf32>
      %346 = arith.subf %338, %345 : vector<2x32xf32>
      %347 = arith.mulf %346, %346 : vector<2x32xf32>
      %cst_142 = arith.constant dense<0.000000e+00> : vector<2xf32>
      %348 = vector.multi_reduction <add>, %347, %cst_142 [1] : vector<2x32xf32> to vector<2xf32>
      %349 = vector.shape_cast %348 : vector<2xf32> to vector<2x1xf32>
      %cst_143 = arith.constant 3.200000e+01 : f32
      %350 = vector.broadcast %cst_143 : f32 to vector<2x1xf32>
      %351 = arith.divf %349, %350 : vector<2x1xf32>
      %352 = vector.broadcast %344 : vector<2x1xf32> to vector<2x32xf32>
      %353 = arith.subf %338, %352 : vector<2x32xf32>
      %cst_144 = arith.constant 9.99999974E-6 : f32
      %354 = vector.broadcast %cst_144 : f32 to vector<2x1xf32>
      %355 = arith.addf %351, %354 : vector<2x1xf32>
      %356 = math.rsqrt %355 : vector<2x1xf32>
      %357 = vector.broadcast %356 : vector<2x1xf32> to vector<2x32xf32>
      %358 = arith.mulf %353, %357 : vector<2x32xf32>
      %359 = vector.broadcast %339 : vector<1x32xf32> to vector<2x32xf32>
      %360 = arith.mulf %358, %359 : vector<2x32xf32>
      %361 = vector.broadcast %340 : vector<1x32xf32> to vector<2x32xf32>
      %362 = arith.addf %360, %361 : vector<2x32xf32>
      %363 = arith.truncf %362 : vector<2x32xf32> to vector<2x32xbf16>
      %c0_145 = arith.constant 0 : index
      %c0_146 = arith.constant 0 : index
      %364 = vector.load %arg19[%c0_145, %c0_146] : memref<32x32xbf16, #tpu.memory_space<vmem>>, vector<32x32xbf16>
      %cst_147 = arith.constant dense<0.000000e+00> : vector<2x32xf32>
      %365 = tpu.matmul %363, %364, %cst_147 {dimension_numbers = #tpu.dot_dimension_numbers<[1], [0], [0], [1], [0, 0, 1, 1], [], []>} : vector<2x32xbf16>, vector<32x32xbf16>, vector<2x32xf32> -> vector<2x32xf32>
      %c0_148 = arith.constant 0 : index
      %c0_149 = arith.constant 0 : index
      %366 = vector.load %arg20[%c0_148, %c0_149] : memref<2x32xf32, #tpu.memory_space<vmem>>, vector<2x32xf32>
      tpu.vector_store %arg20[%c0_148, %c0_149], %365 {strides = array<i32>} : memref<2x32xf32, #tpu.memory_space<vmem>>, vector<2x32xf32>,
    } else {
    }
    return
  }
  func.func @transform_0(%arg0: i32) -> (i32, i32, i32) {
    %c0_i32 = arith.constant 0 : i32
    %c0_i32_0 = arith.constant 0 : i32
    %c0_i32_1 = arith.constant 0 : i32
    %c0_i32_2 = arith.constant 0 : i32
    return %c0_i32, %c0_i32_0, %c0_i32_1 : i32, i32, i32
  }
  func.func @transform_1(%arg0: i32) -> (i32, i32) {
    %c0_i32 = arith.constant 0 : i32
    %c0_i32_0 = arith.constant 0 : i32
    %c0_i32_1 = arith.constant 0 : i32
    return %c0_i32, %c0_i32_0 : i32, i32
  }
  func.func @transform_2(%arg0: i32) -> (i32, i32) {
    %c0_i32 = arith.constant 0 : i32
    %c0_i32_0 = arith.constant 0 : i32
    %c0_i32_1 = arith.constant 0 : i32
    return %c0_i32, %c0_i32_0 : i32, i32
  }
  func.func @transform_3(%arg0: i32) -> (i32, i32) {
    %c0_i32 = arith.constant 0 : i32
    %c0_i32_0 = arith.constant 0 : i32
    %c0_i32_1 = arith.constant 0 : i32
    return %c0_i32, %c0_i32_0 : i32, i32
  }
  func.func @transform_4(%arg0: i32) -> (i32, i32, i32) {
    %c0_i32 = arith.constant 0 : i32
    %c0_i32_0 = arith.constant 0 : i32
    %c0_i32_1 = arith.constant 0 : i32
    return %arg0, %c0_i32, %c0_i32_0 : i32, i32, i32
  }
  func.func @transform_5(%arg0: i32) -> (i32, i32, i32) {
    %c0_i32 = arith.constant 0 : i32
    %c0_i32_0 = arith.constant 0 : i32
    %c0_i32_1 = arith.constant 0 : i32
    return %arg0, %c0_i32, %c0_i32_0 : i32, i32, i32
  }
  func.func @transform_6(%arg0: i32) -> (i32, i32, i32) {
    %c0_i32 = arith.constant 0 : i32
    %c0_i32_0 = arith.constant 0 : i32
    %c0_i32_1 = arith.constant 0 : i32
    return %arg0, %c0_i32, %c0_i32_0 : i32, i32, i32
  }
  func.func @transform_7(%arg0: i32) -> (i32, i32, i32) {
    %c0_i32 = arith.constant 0 : i32
    %c0_i32_0 = arith.constant 0 : i32
    %c0_i32_1 = arith.constant 0 : i32
    return %arg0, %c0_i32, %c0_i32_0 : i32, i32, i32
  }
  func.func @transform_8(%arg0: i32) -> (i32, i32, i32) {
    %c0_i32 = arith.constant 0 : i32
    %c0_i32_0 = arith.constant 0 : i32
    %c0_i32_1 = arith.constant 0 : i32
    return %arg0, %c0_i32, %c0_i32_0 : i32, i32, i32
  }
  func.func @transform_9(%arg0: i32) -> (i32, i32, i32) {
    %c0_i32 = arith.constant 0 : i32
    %c0_i32_0 = arith.constant 0 : i32
    %c0_i32_1 = arith.constant 0 : i32
    return %arg0, %c0_i32, %c0_i32_0 : i32, i32, i32
  }
  func.func @transform_10(%arg0: i32) -> (i32, i32, i32) {
    %c0_i32 = arith.constant 0 : i32
    %c0_i32_0 = arith.constant 0 : i32
    %c0_i32_1 = arith.constant 0 : i32
    return %arg0, %c0_i32, %c0_i32_0 : i32, i32, i32
  }
  func.func @transform_11(%arg0: i32) -> (i32, i32, i32) {
    %c0_i32 = arith.constant 0 : i32
    %c0_i32_0 = arith.constant 0 : i32
    %c0_i32_1 = arith.constant 0 : i32
    return %arg0, %c0_i32, %c0_i32_0 : i32, i32, i32
  }
  func.func @transform_12(%arg0: i32) -> (i32, i32, i32) {
    %c0_i32 = arith.constant 0 : i32
    %c0_i32_0 = arith.constant 0 : i32
    %c0_i32_1 = arith.constant 0 : i32
    return %arg0, %c0_i32, %c0_i32_0 : i32, i32, i32
  }
  func.func @transform_13(%arg0: i32) -> (i32, i32, i32) {
    %c0_i32 = arith.constant 0 : i32
    %c0_i32_0 = arith.constant 0 : i32
    %c0_i32_1 = arith.constant 0 : i32
    return %arg0, %c0_i32, %c0_i32_0 : i32, i32, i32
  }
  func.func @transform_14(%arg0: i32) -> (i32, i32, i32) {
    %c0_i32 = arith.constant 0 : i32
    %c0_i32_0 = arith.constant 0 : i32
    %c0_i32_1 = arith.constant 0 : i32
    return %arg0, %c0_i32, %c0_i32_0 : i32, i32, i32
  }
  func.func @transform_15(%arg0: i32) -> (i32, i32, i32) {
    %c0_i32 = arith.constant 0 : i32
    %c0_i32_0 = arith.constant 0 : i32
    %c0_i32_1 = arith.constant 0 : i32
    return %arg0, %c0_i32, %c0_i32_0 : i32, i32, i32
  }
  func.func @transform_16(%arg0: i32) -> (i32, i32) {
    %c0_i32 = arith.constant 0 : i32
    %c0_i32_0 = arith.constant 0 : i32
    %c0_i32_1 = arith.constant 0 : i32
    return %c0_i32, %c0_i32_0 : i32, i32
  }
  func.func @transform_17(%arg0: i32) -> (i32, i32) {
    %c0_i32 = arith.constant 0 : i32
    %c0_i32_0 = arith.constant 0 : i32
    %c0_i32_1 = arith.constant 0 : i32
    return %c0_i32, %c0_i32_0 : i32, i32
  }
  func.func @transform_18(%arg0: i32) -> (i32, i32) {
    %c0_i32 = arith.constant 0 : i32
    %c0_i32_0 = arith.constant 0 : i32
    %c0_i32_1 = arith.constant 0 : i32
    return %c0_i32, %c0_i32_0 : i32, i32
  }
  func.func @transform_19(%arg0: i32) -> (i32, i32) {
    %c0_i32 = arith.constant 0 : i32
    %c0_i32_0 = arith.constant 0 : i32
    %c0_i32_1 = arith.constant 0 : i32
    return %c0_i32, %c0_i32_0 : i32, i32
  }
}

</mosaic_0001>

<bundles_post_ra>
// kernel: visual_transformer_forward.2
= control target key start
LH: loop header
LB: loop body
LE: loop exit
PB: predicated region body
PF: predicated region fallthrough
CT: control target
= control target key end

     0   :  { %vm189_vm0 = vcmask 257024   ;;  %s322_s1 = inlined_call_operand.vmem [shape: bf16[256,32], index: 1, kind: input, shape index: {}]   ;;  %s323_s0 = inlined_call_operand.vmem [shape: bf16[8,256], index: 0, kind: input, shape index: {}]   ;;  %s324_s2 = inlined_call_operand.vmem [shape: bf16[8,32], index: 2, kind: output, shape index: {}]  }
   0x1   :  { %v235_v0 = vld [vmem:[%s322_s1 + $0x40] sm:$0xff]   ;;  %v237_v2 = vld [vmem:[%s322_s1 + $0x48] sm:$0xff]   ;;  %v239_v4 = vld [vmem:[%s322_s1 + $0x50] sm:$0xff]  }
   0x2   :  { %v236_v1 = vld [vmem:[%s322_s1] sm:$0xff]   ;;  %213 = vmatprep.subr.bf16.mxu0 %v235_v0  ;;  %v238_v3 = vld [vmem:[%s322_s1 + $0x8] sm:$0xff]   ;;  %v240_v5 = vld [vmem:[%s322_s1 + $0x10] sm:$0xff]  }
   0x3   :  { %214 = vmatpush3.bf16.msra.mxu0 %v236_v1  ;;  %v241_v6 = vld [vmem:[%s322_s1 + $0x58] sm:$0xff]   ;;  %v243_v8 = vld [vmem:[%s322_s1 + $0x60] sm:$0xff]   ;;  %v245_v10 = vld [vmem:[%s322_s1 + $0x68] sm:$0xff]  }
   0x4   :  { %215 = vmatprep.subr.bf16.mxu0 %v237_v2  ;;  %v242_v7 = vld [vmem:[%s322_s1 + $0x18] sm:$0xff]   ;;  %v244_v9 = vld [vmem:[%s322_s1 + $0x20] sm:$0xff]   ;;  %v246_v13 = vld [vmem:[%s322_s1 + $0x28] sm:$0xff]  }
   0x5   :  { %v12_v11 = vld [vmem:[%s323_s0] sm:$0xff]  ;;  %v247_v14 = vld [vmem:[%s322_s1 + $0x70] sm:$0xff]   ;;  %v249_v16 = vld [vmem:[%s322_s1 + $0x78] sm:$0xff]  }
   0x6   :  { %v196_v12 = vcombine.high %v12_v11, %v12_v11  ;;  %v248_v15 = vld [vmem:[%s322_s1 + $0x30] sm:$0xff]   ;;  %v250_v17 = vld [vmem:[%s322_s1 + $0x38] sm:$0xff]   ;;  %v195_v18 = vcombine.low %v12_v11, %v12_v11 }
   0x7   :  { %216 = vmatpush3.bf16.msra.mxu0 %v238_v3 }
   0x8   :  { %217 = vmatprep.subr.bf16.mxu0 %v239_v4  ;;  %180 = vmatprep.mubr.bf16.mxu0 %v196_v12 }
   0xb   :  { %218 = vmatpush3.bf16.msra.mxu0 %v240_v5 }
   0xc   :  { %219 = vmatprep.subr.bf16.mxu0 %v241_v6 }
   0xf   :  { %220 = vmatpush3.bf16.msra.mxu0 %v242_v7 }
  0x10   :  { %221 = vmatprep.subr.bf16.mxu0 %v243_v8 }
  0x13   :  { %222 = vmatpush3.bf16.msra.mxu0 %v244_v9 }
  0x14   :  { %223 = vmatprep.subr.bf16.mxu0 %v245_v10 }
  0x17   :  { %224 = vmatpush3.bf16.msra.mxu0 %v246_v13 }
  0x18   :  { %225 = vmatprep.subr.bf16.mxu0 %v247_v14 }
  0x1b   :  { %226 = vmatpush3.bf16.msra.mxu0 %v248_v15 }
  0x1c   :  { %227 = vmatprep.subr.bf16.mxu0 %v249_v16 }
  0x1f   :  { %228 = vmatpush3.bf16.msra.mxu0 %v250_v17 }
  0x22   :  { %181 = vmatmul.mubr.bf16.vlgmr.msra.gmra.mrb[0].mxu0 %v195_v18 }
  0xf5   :  { %v229_v19 = vpop.f32.mrb[0].mxu0 }
  0xf6   :  { %v230_v20 = vpop.f32.mrb[1].mxu0 }
  0xf7   :  { %v231_v21 = vadd.f32 %v230_v20, %v229_v19  ;;  %v232_v22 = vpop.f32.mrb[2].mxu0 }
  0xf8   :  { %v233_v23 = vpop.f32.mrb[3].mxu0 }
  0xf9   :  { %v188_v24 = vpack.c.bf16 %v231_v21, %v231_v21 }
  0xfb   :  { %190 = vst.msk [vmem:[%s324_s2] sm:$0xf] %vm189_vm0, %v188_v24 }

// kernel: visual_transformer_forward.3
= control target key start
LH: loop header
LB: loop body
LE: loop exit
PB: predicated region body
PF: predicated region fallthrough
CT: control target
= control target key end

     0   :  { %s3713_s0 = inlined_call_operand.vmem [shape: bf16[2,5,32], index: 0, kind: input, shape index: {}]   ;;  %s3714_s1 = inlined_call_operand.vmem [shape: f32[5,32], index: 1, kind: input, shape index: {}]   ;;  %s3715_s2 = inlined_call_operand.vmem [shape: f32[1,32], index: 2, kind: input, shape index: {}]   ;;  %s3716_s3 = inlined_call_operand.vmem [shape: f32[1,32], index: 3, kind: input, shape index: {}]   ;;  %s3717_s4 = inlined_call_operand.vmem [shape: f32[2,1,32], index: 4, kind: input, shape index: {}]   ;;  %s3718_s5 = inlined_call_operand.vmem [shape: f32[2,1,32], index: 5, kind: input, shape index: {}]   ;;  %s3719_s6 = inlined_call_operand.vmem [shape: bf16[2,32,96], index: 6, kind: input, shape index: {}]   ;;  %s3720_s7 = inlined_call_operand.vmem [shape: f32[2,1,96], index: 7, kind: input, shape index: {}]   ;;  %s3721_s8 = inlined_call_operand.vmem [shape: bf16[2,32,32], index: 8, kind: input, shape index: {}]   ;;  %s3722_s9 = inlined_call_operand.vmem [shape: f32[2,1,32], index: 9, kind: input, shape index: {}]   ;;  %s3723_s10 = inlined_call_operand.vmem [shape: f32[2,1,32], index: 10, kind: input, shape index: {}]   ;;  %s3724_s11 = inlined_call_operand.vmem [shape: f32[2,1,32], index: 11, kind: input, shape index: {}]   ;;  %s3725_s12 = inlined_call_operand.vmem [shape: bf16[2,32,128], index: 12, kind: input, shape index: {}]   ;;  %s3726_s13 = inlined_call_operand.vmem [shape: f32[2,1,128], index: 13, kind: input, shape index: {}]   ;;  %s3727_s14 = inlined_call_operand.vmem [shape: bf16[2,128,32], index: 14, kind: input, shape index: {}]   ;;  %s3728_s15 = inlined_call_operand.vmem [shape: f32[2,1,32], index: 15, kind: input, shape index: {}]   ;;  %s3729_s16 = inlined_call_operand.vmem [shape: f32[1,32], index: 16, kind: input, shape index: {}]   ;;  %s3730_s17 = inlined_call_operand.vmem [shape: f32[1,32], index: 17, kind: input, shape index: {}]   ;;  %s3731_s18 = inlined_call_operand.vmem [shape: bf16[32,32], index: 18, kind: input, shape index: {}]   ;;  %s3732_s19 = inlined_call_operand.hbm [shape: f32[2,32], index: 19, kind: output, shape index: {}]  }
   0x1   :  { %3741 = sst [smem:[#allocation9_spill]] %s3713_s0 }
   0x2   :  { %3742 = sst [smem:[#allocation10_spill]] %s3714_s1 }
   0x3   :  { %3743 = sst [smem:[#allocation11_spill]] %s3715_s2 }
   0x4   :  { %3744 = sst [smem:[#allocation12_spill]] %s3716_s3 }
   0x5   :  { %3745 = sst [smem:[#allocation13_spill]] %s3719_s6 }
   0x6   :  { %3746 = sst [smem:[#allocation14_spill]] %s3721_s8 }
   0x7   :  { %3747 = sst [smem:[#allocation15_spill]] %s3729_s16 }
   0x8   :  { %3748 = sst [smem:[#allocation16_spill]] %s3730_s17 }
   0x9   :  { %3749 = sst [smem:[#allocation17_spill]] %s3731_s18 }
   0xa   :  { %3750 = sst [smem:[#allocation18_spill]] %s3732_s19 }
   0xb   :  { %24 = vsyncpa [#allocation6], 0  ;;  %s3207_s0 = smov 0  }
   0xc LB: > { %3751 = sst [smem:[#allocation8_spill]] %s3085_s0  ;;  %s3213_s30 = sadd.s32 4294967295, %s3085_s0   ;;  %s3085_s0 = sphi %s3207_s0, %s30_s0  }
   0xd   : > { %p2610_p0 = scmp.ge.s32.totalorder %s3085_s0, 1  ;;  %p627_p1 = scmp.lt.s32.totalorder %s3085_s0, 3 }
   0xf   : > { %p628_p2 = pnand %p2610_p0, %p627_p1 }
  0x10   : > { %p717_p3 = scmp.lt.s32.totalorder (!%p628_p2), %s3213_s30, 1  ;;  %s3752_s6 = sld [smem:[#allocation13_spill]] (!%p628_p2) }
  0x11   : > { %631 = sbr.rel (%p628_p2) target bundleno = 6293 (0x1895), region = 96  ;;  %s3753_s8 = sld [smem:[#allocation14_spill]] (!%p628_p2) }
  0x12   : > { %p2619_p4 = scmp.ne.s32.totalorder (!%p628_p2), %s3213_s30, 0 }
  0x18   : > { %s3219_s20 = scalar_select %p717_p3, %s3213_s30, 1 }
  0x19   : > { %765 = sbr.rel (%p2619_p4) target bundleno = 357 (0x165), region = 100  ;;  %s3754_s28 = sld [smem:[#allocation9_spill]] (!%p2619_p4)  ;;  %vm775_vm0 = vcmask (!%p2619_p4), 258048  }
  0x1a   : > { %s2678_s25 = sshll.u32 %s3219_s20, 4  ;;  %s741_s16 = scalar_lea.vmem %s3723_s10, %s3219_s20 }
  0x1b   : > { %s3237_s21 = scalar_lea.vmem %s3752_s6, %s2678_s25  ;;  %s3242_s19 = scalar_lea.vmem %s3753_s8, %s2678_s25 }
  0x1c   : > { %s744_s27 = scalar_lea.vmem %s3724_s11, %s3219_s20  ;;  %s3259_s6 = scalar_lea.vmem %s3725_s12, %s2678_s25 }
  0x1d   : > { %s2681_s18 = sshll.u32 %s3219_s20, 6  ;;  %s760_s3 = scalar_lea.vmem %s3728_s15, %s3219_s20 }
  0x1e   : > { %s3269_s2 = scalar_lea.vmem %s3727_s14, %s2681_s18  ;;  %s3755_s1 = sld [smem:[#allocation10_spill]] (!%p2619_p4) }
  0x1f   : > { %v766_v0 = vld [vmem:[%s3754_s28] sm:$0x7] (!%p2619_p4)  ;;  %v767_v3 = vld [vmem:[%s3754_s28 + $0x4] sm:$0x7] (!%p2619_p4)  ;;  %s3756_s22 = sld [smem:[#allocation11_spill]] (!%p2619_p4)  ;;  %s3757_s26 = sld [smem:[#allocation12_spill]] (!%p2619_p4) }
  0x20   : > { %v768_v2 = vunpack.c.l.bf16 %v766_v0  ;;  %v769_v4 = vunpack.c.l.bf16 %v767_v3 }
  0x24   : > { %v770_v1 = vld [vmem:[%s3755_s1] sm:$0x1f] }
  0x25   : > { %v771_v5 = vadd.f32 %v770_v1, %v768_v2  ;;  %v772_v6 = vadd.f32 %v770_v1, %v769_v4  ;;  %v2620_v26 = vld [vmem:[%s3756_s22] ss:$0 sm:$0xff] }
  0x26   : > { %v2621_v28 = vld [vmem:[%s3757_s26] ss:$0 sm:$0xff] }
  0x27   : > { %v776_v7 = vsel %vm775_vm0, %v771_v5, 0.0  ;;  %v779_v8 = vsel %vm775_vm0, %v772_v6, 0.0 }
  0x28   : > { %777 = vadd.xlane.f32.xlu0 %v776_v7 }
  0x2c   : > { %780 = vadd.xlane.f32.xlu0 %v779_v8 }
  0xb5   : > { %v778_v9 = vpop.xlane.xlu0 %777 }
  0xb6   : > { %v783_v10 = vmul.f32 0.03125, %v778_v9 }
  0xb8   : > { %v785_v11 = vsub.f32 %v771_v5, %v783_v10 }
  0xb9   : > { %v781_v12 = vpop.xlane.xlu0 %780 }
  0xba   : > { %v784_v13 = vmul.f32 0.03125, %v781_v12  ;;  %v787_v14 = vmul.f32 %v785_v11, %v785_v11 }
  0xbc   : > { %v786_v15 = vsub.f32 %v772_v6, %v784_v13  ;;  %v789_v16 = vsel %vm775_vm0, %v787_v14, 0.0 }
  0xbd   : > { %790 = vadd.xlane.f32.xlu1 %v789_v16 }
  0xbe   : > { %v788_v17 = vmul.f32 %v786_v15, %v786_v15 }
  0xc0   : > { %v792_v18 = vsel %vm775_vm0, %v788_v17, 0.0 }
  0xc1   : > { %793 = vadd.xlane.f32.xlu1 %v792_v18 }
 0x14a   : > { %v791_v19 = vpop.xlane.xlu1 %790 }
 0x14b   : > { %v795_v20 = vmul.f32 0.03125, %v791_v19 }
 0x14d   : > { %v797_v21 = vadd.f32 1e-05, %v795_v20 }
 0x14e   : > { %v794_v22 = vpop.xlane.xlu1 %793 }
 0x14f   : > { %2979 = vrsqrt.f32 %v797_v21  ;;  %v796_v23 = vmul.f32 0.03125, %v794_v22 }
 0x151   : > { %v798_v24 = vadd.f32 1e-05, %v796_v23 }
 0x153   : > { %2981 = vrsqrt.f32 %v798_v24 }
 0x159   : > { %v2980_v25 = vpop.eup %2979 }
 0x15a   : > { %v801_v27 = vmul.f32 %v2980_v25, %v785_v11 }
 0x15c   : > { %v809_v29 = vmul.f32 %v2620_v26, %v801_v27 }
 0x15d   : > { %v2982_v30 = vpop.eup %2981 }
 0x15e   : > { %v817_v31 = vadd.f32 %v2621_v28, %v809_v29  ;;  %v802_v32 = vmul.f32 %v2982_v30, %v786_v15 }
 0x160   : > { %819 = vst.msk [vmem:[#allocation2] sm:$0x1f] %vm775_vm0, %v817_v31  ;;  %v810_v33 = vmul.f32 %v2620_v26, %v802_v32 }
 0x162   : > { %v818_v34 = vadd.f32 %v2621_v28, %v810_v33 }
 0x164   : > { %820 = vst.msk [vmem:[#allocation2 + $0x8] sm:$0x1f] %vm775_vm0, %v818_v34 }
 0x165 PF: > { %vm858_vm1 = vcmask 258048   ;;  %v3304_v42 = vld [vmem:[%s3237_s21] sm:$0xff]   ;;  %v3087_v43 = vmov 0.0   ;;  %vm3088_vm2 = vmmov 0   ;;  %v3311_v44 = vld [vmem:[%s3237_s21 + $0x8] sm:$0xff]   ;;  %s3758_s29 = scalar_lea.vmem %s3717_s4, %s3219_s20  ;;  %s3759_s17 = scalar_lea.vmem %s3718_s5, %s3219_s20  ;;  %vm906_vm3 = vcmask 261120  }
 0x166   : > { %2753 = vmatprep.subr.bf16.mxu1 %v3087_v43  ;;  %2757 = vmatprep.mubr.msk.bf16.mxu1 %vm3088_vm2, %v3087_v43  ;;  %v3324_v49 = vld [vmem:[%s3758_s29] ss:$0 sm:$0xff]  ;;  %s3760_s22 = scalar_lea.vmem %s3720_s7, %s3219_s20  ;;  %s3089_s24 = smov 64   ;;  %vm956_vm4 = vcmask 64512   ;;  %vm1022_vm5 = vcmask 1041408   ;;  %vm1023_vm6 = vcmask 1042432  }
 0x167   : > { %v3297_v35 = vld [vmem:[#allocation2] sm:$0x1f]  ;;  %2754 = vmatpush3.bf16.msra.mxu1 %v3304_v42  ;;  %2779 = vmatprep.subr.bf16.mxu0 %v3087_v43  ;;  %s3090_s23 = smov 96   ;;  %v3091_v0 = vmov 65535   ;;  %vm1003_vm7 = vcmask 36864   ;;  %s3092_s26 = smov 80  }
 0x168   : > { %v859_v36 = vsel %vm858_vm1, %v3297_v35, 0.0  ;;  %2755 = vmatprep.subr.bf16.mxu1 %v3087_v43  ;;  %2781 = vmatprep.mubr.msk.bf16.mxu0 %vm3088_vm2, %v3087_v43  ;;  %v3331_v51 = vld [vmem:[%s3759_s17] ss:$0 sm:$0xff]  ;;  %v1024_v1 = vsel %vm1022_vm5, 4294967295, %v3091_v0  ;;  %s3093_s25 = smov 88   ;;  %s3094_s21 = smov 120  }
 0x169   : > { %860 = vadd.xlane.f32.xlu0 %v859_v36  ;;  %v3343_v55 = vld [vmem:[%s3760_s22] ss:$0 sm:$0xff]  ;;  %v3354_v3 = vsel %vm1023_vm6, %v1024_v1, 0  ;;  %s3095_s29 = smov 112   ;;  %s3096_s0 = smov 72   ;;  %vm1018_vm8 = vcmask 39936  }
 0x16a   : > { %s3097_s1 = smov 104   ;;  %vm1069_vm9 = vcmask 61440   ;;  %s3098_s17 = smov 48   ;;  %vm1186_vm10 = vcmask 127040   ;;  %vm1302_vm11 = vcmask 192640   ;;  %vm1418_vm12 = vcmask 258240  }
 0x16b   : > { %2756 = vmatpush3.bf16.msra.mxu1 %v3311_v44  ;;  %s3099_s8 = smov 56   ;;  %s3737_s18 = smov 40   ;;  %vm1678_vm13 = vcmask 253952  }
 0x16c   : > { %2761 = vmatprep.subr.bf16.mxu1 %v3087_v43  ;;  %s3738_s22 = smov 8   ;;  %p2668_p5 = scmp.ne.s32.totalorder %s3213_s30, 1 }
 0x16d   : > { %vm2364_vm14 = vcmask (!%p2668_p5), 254976   ;;  %vm3105_vm15 = vmmov (!%p2668_p5), 0  }
 0x1f6   : > { %v861_v37 = vpop.xlane.xlu0 %860 }
 0x1f7   : > { %v863_v38 = vmul.f32 0.03125, %v861_v37 }
 0x1f9   : > { %v864_v39 = vsub.f32 %v3297_v35, %v863_v38 }
 0x1fb   : > { %v865_v40 = vmul.f32 %v864_v39, %v864_v39 }
 0x1fd   : > { %v866_v41 = vsel %vm858_vm1, %v865_v40, 0.0 }
 0x1fe   : > { %867 = vadd.xlane.f32.xlu0 %v866_v41 }
 0x28b   : > { %v868_v45 = vpop.xlane.xlu0 %867 }
 0x28c   : > { %v869_v46 = vmul.f32 0.03125, %v868_v45 }
 0x28e   : > { %v870_v47 = vadd.f32 1e-05, %v869_v46 }
 0x290   : > { %2997 = vrsqrt.f32 %v870_v47 }
 0x29a   : > { %v2998_v48 = vpop.eup %2997 }
 0x29b   : > { %v872_v50 = vmul.f32 %v2998_v48, %v864_v39 }
 0x29d   : > { %v879_v52 = vmul.f32 %v3324_v49, %v872_v50 }
 0x29f   : > { %v886_v53 = vadd.f32 %v3331_v51, %v879_v52 }
 0x2a1   : > { %v887_v54 = vpack.c.bf16 %v886_v53, %v886_v53 }
 0x2a3   : > { %2758 = vmatmul.mubr.msk.bf16.vlgmr.msra.gmra.mrb[0].mxu1 %vm906_vm3, %v887_v54 }
 0x2a4   : > { %2763 = vmatprep.mubr.msk.bf16.mxu1 %vm3088_vm2, %v3087_v43 }
 0x376   : > { %v944_v56 = vpop.f32.mrb[0].mxu1 }
 0x377   : > { %v945_v57 = vadd.f32 %v3343_v55, %v944_v56  ;;  %v2759_v58 = vpop.f32.mrb[1].mxu1 }
 0x378   : > { %v947_v59 = vpop.f32.mrb[2].mxu1 }
 0x379   : > { %v3346_v60 = vpack.c.bf16 %v945_v57, %v945_v57  ;;  %v2760_v61 = vpop.f32.mrb[3].mxu1  ;;  %v950_v2 = vmul.f32 0.35355338, %v945_v57 }
 0x37b   : > { %1016 = vrot.lane.b32.xlu0 %v3346_v60, %s3089_s24  ;;  %954 = vrot.lane.b32.xlu1 %v3346_v60, %s3090_s23  ;;  %v951_v5 = vpack.c.bf16 %v950_v2, %v950_v2 }
 0x3ed   : > { %v955_v62 = vpop.permute.xlu1 %954  ;;  %v1017_v4 = vpop.permute.xlu0 %1016 }
 0x3ee   : > { %v961_v63 = vsel %vm956_vm4, %v955_v62, 0  ;;  %v1027_v6 = vand.u32 %v3354_v3, %v1017_v4 }
 0x3ef   : > { %2762 = vmatpush3.bf16.xpose.msra.mxu1 %v961_v63 }
 0x3f0   : > { %2767 = vmatprep.subr.bf16.mxu1 %v3087_v43 }
 0x3f6   : > { %2764 = vmatmul.mubr.msk.bf16.vlgmr.msra.gmra.mrb[4].mxu1 %vm956_vm4, %v951_v5 }
 0x3f7   : > { %2768 = vmatpush3.bf16.msra.mxu1 %v1027_v6  ;;  %2769 = vmatprep.mubr.msk.bf16.mxu1 %vm3088_vm2, %v3087_v43 }
 0x3f8   : > { %2773 = vmatprep.subr.bf16.mxu1 %v3087_v43 }
 0x4c9   : > { %v997_v7 = vpop.f32.mrb[4].mxu1 }
 0x4ca   : > { %v2765_v8 = vpop.f32.mrb[5].mxu1  ;;  %v1004_v9 = vsel %vm1003_vm7, %v997_v7, -inf }
 0x4cb   : > { %1005 = vmax.xlane.f32.xlu1 %v1004_v9  ;;  %v1000_v10 = vpop.f32.mrb[6].mxu1 }
 0x4cc   : > { %v2766_v11 = vpop.f32.mrb[7].mxu1 }
 0x4dc   : > { %1190 = vrot.lane.b32.xlu1 %v3346_v60, %s3092_s26 }
 0x558   : > { %v1006_v12 = vpop.xlane.xlu1 %1005 }
 0x559   : > { %v1007_v13 = vsub.f32 %v997_v7, %v1006_v12 }
 0x55b   : > { %v1008_v14 = vmul.f32 1.442695, %v1007_v13 }
 0x55c   : > { %v1191_v24 = vpop.permute.xlu1 %1190 }
 0x55d   : > { %2999 = vpow2.f32 %v1008_v14  ;;  %v1196_v26 = vsel %vm956_vm4, %v1191_v24, 0 }
 0x567   : > { %v3000_v15 = vpop.eup %2999 }
 0x568   : > { %v1010_v16 = vsel %vm1003_vm7, %v3000_v15, 0.0 }
 0x569   : > { %1011 = vadd.xlane.f32.xlu0 %v1010_v16 }
 0x57f   : > { %1074 = vrot.lane.b32.xlu0 %v3346_v60, %s3093_s25 }
 0x583   : > { %1072 = vrot.lane.b32.xlu0 %v951_v5, %s3094_s21 }
 0x587   : > { %1188 = vrot.lane.b32.xlu0 %v951_v5, %s3095_s29 }
 0x58b   : > { %1306 = vrot.lane.b32.xlu0 %v3346_v60, %s3096_s0 }
 0x58f   : > { %1304 = vrot.lane.b32.xlu0 %v951_v5, %s3097_s1 }
 0x5f6   : > { %v1012_v17 = vpop.xlane.xlu0 %1011 }
 0x5f7   : > { %3001 = vrcp.f32 %v1012_v17 }
 0x5fa   : > { %v1075_v19 = vpop.permute.xlu0 %1074 }
 0x5fb   : > { %v1080_v22 = vsel %vm956_vm4, %v1075_v19, 0 }
 0x5fe   : > { %v1073_v23 = vpop.permute.xlu0 %1072 }
 0x601   : > { %v3002_v18 = vpop.eup %3001 }
 0x602   : > { %v1014_v20 = vmul.f32 %v3002_v18, %v3000_v15  ;;  %v1189_v25 = vpop.permute.xlu0 %1188 }
 0x604   : > { %v1015_v21 = vpack.c.bf16 %v1014_v20, %v1014_v20 }
 0x606   : > { %2770 = vmatmul.mubr.msk.bf16.vlgmr.msra.gmra.mrb[8].mxu1 %vm1018_vm8, %v1015_v21  ;;  %v1307_v27 = vpop.permute.xlu0 %1306 }
 0x607   : > { %2774 = vmatpush3.bf16.xpose.msra.mxu1 %v1080_v22  ;;  %2775 = vmatprep.mubr.msk.bf16.mxu1 %vm3088_vm2, %v3087_v43  ;;  %v1312_v28 = vsel %vm956_vm4, %v1307_v27, 0 }
 0x608   : > { %2785 = vmatprep.subr.bf16.mxu1 %v3087_v43 }
 0x60a   : > { %v1305_v29 = vpop.permute.xlu0 %1304 }
 0x60e   : > { %2776 = vmatmul.mubr.msk.bf16.vlgmr.msra.gmra.mrb[12].mxu1 %vm956_vm4, %v1073_v23 }
 0x60f   : > { %2786 = vmatpush3.bf16.xpose.msra.mxu1 %v1196_v26  ;;  %2787 = vmatprep.mubr.msk.bf16.mxu1 %vm3088_vm2, %v3087_v43 }
 0x610   : > { %2797 = vmatprep.subr.bf16.mxu1 %v3087_v43 }
 0x616   : > { %2788 = vmatmul.mubr.msk.bf16.vlgmr.msra.gmra.mrb[16].mxu1 %vm956_vm4, %v1189_v25 }
 0x617   : > { %2798 = vmatpush3.bf16.xpose.msra.mxu1 %v1312_v28  ;;  %2799 = vmatprep.mubr.msk.bf16.mxu1 %vm3088_vm2, %v3087_v43 }
 0x618   : > { %2809 = vmatprep.subr.bf16.mxu1 %v3087_v43 }
 0x61e   : > { %2800 = vmatmul.mubr.msk.bf16.vlgmr.msra.gmra.mrb[20].mxu1 %vm956_vm4, %v1305_v29 }
 0x61f   : > { %2813 = vmatprep.mubr.msk.bf16.mxu1 %vm3088_vm2, %v3087_v43 }
 0x6d9   : > { %v1063_v30 = vpop.f32.mrb[8].mxu1 }
 0x6da   : > { %1070 = vst.msk [vmem:[#allocation4] sm:$0x1f] %vm1069_vm9, %v1063_v30  ;;  %v2771_v31 = vpop.f32.mrb[9].mxu1  ;;  %v3420_v30 = vld [vmem:[%s3242_s19] sm:$0xff]  }
 0x6db   : > { %v1066_v32 = vpop.f32.mrb[10].mxu1  ;;  %2810 = vmatpush3.bf16.msra.mxu1 %v3420_v30  ;;  %v3424_v31 = vld [vmem:[%s3242_s19 + $0x8] sm:$0xff]  }
 0x6dc   : > { %v2772_v33 = vpop.f32.mrb[11].mxu1  ;;  %2811 = vmatprep.subr.bf16.mxu1 %v3087_v43 }
 0x6df   : > { %2812 = vmatpush3.bf16.msra.mxu1 %v3424_v31 }
 0x6e0   : > { %2825 = vmatprep.subr.bf16.mxu1 %v3087_v43 }
 0x6e1   : > { %v1116_v34 = vpop.f32.mrb[12].mxu1 }
 0x6e2   : > { %v2777_v36 = vpop.f32.mrb[13].mxu1  ;;  %v1122_v37 = vsel %vm1003_vm7, %v1116_v34, -inf }
 0x6e3   : > { %1123 = vmax.xlane.f32.xlu0 %v1122_v37  ;;  %v1119_v38 = vpop.f32.mrb[14].mxu1 }
 0x6e4   : > { %v2778_v39 = vpop.f32.mrb[15].mxu1 }
 0x6e9   : > { %v1232_v40 = vpop.f32.mrb[16].mxu1 }
 0x6ea   : > { %v2789_v41 = vpop.f32.mrb[17].mxu1  ;;  %v1238_v45 = vsel %vm1003_vm7, %v1232_v40, -inf }
 0x6eb   : > { %1239 = vmax.xlane.f32.xlu1 %v1238_v45  ;;  %v1235_v46 = vpop.f32.mrb[18].mxu1 }
 0x6ec   : > { %v2790_v47 = vpop.f32.mrb[19].mxu1 }
 0x6f1   : > { %v1348_v48 = vpop.f32.mrb[20].mxu1 }
 0x6f2   : > { %v2801_v50 = vpop.f32.mrb[21].mxu1  ;;  %v1354_v52 = vsel %vm1003_vm7, %v1348_v48, -inf }
 0x6f3   : > { %1355 = vmax.xlane.f32.xlu0 %v1354_v52  ;;  %v1351_v53 = vpop.f32.mrb[22].mxu1  ;;  %v3437_v50 = vld [vmem:[#allocation2 + $0x8] sm:$0x1f] }
 0x6f4   : > { %v2802_v54 = vpop.f32.mrb[23].mxu1  ;;  %v1682_v52 = vsel %vm858_vm1, %v3437_v50, 0.0 }
 0x6fc   : > { %1250 = vrot.lane.b32.xlu1 %v3346_v60, %s3098_s17 }
 0x770   : > { %v1124_v56 = vpop.xlane.xlu0 %1123 }
 0x771   : > { %v1125_v57 = vsub.f32 %v1116_v34, %v1124_v56 }
 0x773   : > { %v1126_v58 = vmul.f32 1.442695, %v1125_v57 }
 0x775   : > { %3003 = vpow2.f32 %v1126_v58 }
 0x778   : > { %v1240_v59 = vpop.xlane.xlu1 %1239 }
 0x779   : > { %v1241_v61 = vsub.f32 %v1232_v40, %v1240_v59 }
 0x77b   : > { %v1242_v62 = vmul.f32 1.442695, %v1241_v61 }
 0x77c   : > { %v1251_v12 = vpop.permute.xlu1 %1250 }
 0x77d   : > { %3005 = vpow2.f32 %v1242_v62  ;;  %v1256_v18 = vand.u32 %v1251_v12, %v3354_v3 }
 0x77f   : > { %v3004_v63 = vpop.eup %3003 }
 0x780   : > { %v1356_v0 = vpop.xlane.xlu0 %1355  ;;  %v1128_v1 = vsel %vm1003_vm7, %v3004_v63, 0.0 }
 0x781   : > { %v1357_v2 = vsub.f32 %v1348_v48, %v1356_v0  ;;  %1129 = vadd.xlane.f32.xlu0 %v1128_v1 }
 0x783   : > { %v1358_v4 = vmul.f32 1.442695, %v1357_v2 }
 0x785   : > { %3007 = vpow2.f32 %v1358_v4 }
 0x787   : > { %v3006_v5 = vpop.eup %3005 }
 0x788   : > { %v1244_v6 = vsel %vm1003_vm7, %v3006_v5, 0.0 }
 0x789   : > { %1245 = vadd.xlane.f32.xlu0 %v1244_v6 }
 0x78f   : > { %v3008_v7 = vpop.eup %3007 }
 0x790   : > { %v1360_v8 = vsel %vm1003_vm7, %v3008_v7, 0.0 }
 0x791   : > { %1361 = vadd.xlane.f32.xlu1 %v1360_v8 }
 0x79f   : > { %1134 = vrot.lane.b32.xlu0 %v3346_v60, %s3099_s8 }
 0x7a2   : > { %1366 = vrot.lane.b32.xlu1 %v3346_v60, %s3737_s18  ;;  %s3740_s18 = smov 16  }
 0x80e   : > { %v1130_v9 = vpop.xlane.xlu0 %1129 }
 0x80f   : > { %3009 = vrcp.f32 %v1130_v9  ;;  %v3459_v9 = vld [vmem:[%s3259_s6] sm:$0xff]  }
 0x816   : > { %v1246_v10 = vpop.xlane.xlu0 %1245 }
 0x817   : > { %3011 = vrcp.f32 %v1246_v10  ;;  %v3464_v10 = vld [vmem:[%s3259_s6 + $0x8] sm:$0xff]  }
 0x819   : > { %v3010_v11 = vpop.eup %3009 }
 0x81a   : > { %v1135_v13 = vpop.permute.xlu0 %1134  ;;  %v1132_v14 = vmul.f32 %v3010_v11, %v3004_v63 }
 0x81b   : > { %v1140_v15 = vand.u32 %v1135_v13, %v3354_v3 }
 0x81c   : > { %v1133_v17 = vpack.c.bf16 %v1132_v14, %v1132_v14 }
 0x81d   : > { %2780 = vmatpush3.bf16.msra.mxu0 %v1140_v15 }
 0x81e   : > { %v1362_v16 = vpop.xlane.xlu1 %1361  ;;  %2791 = vmatprep.subr.bf16.mxu0 %v3087_v43 }
 0x81f   : > { %3013 = vrcp.f32 %v1362_v16 }
 0x820   : > { %2782 = vmatmul.mubr.msk.bf16.vlgmr.msra.gmra.mrb[0].mxu0 %vm1018_vm8, %v1133_v17 }
 0x821   : > { %v3012_v60 = vpop.eup %3011  ;;  %2792 = vmatpush3.bf16.msra.mxu0 %v1256_v18  ;;  %2793 = vmatprep.mubr.msk.bf16.mxu0 %vm3088_vm2, %v3087_v43  ;;  %v3473_v18 = vld [vmem:[%s741_s16] ss:$0 sm:$0xff]  ;;  %s3769_s16 = sld [smem:[#allocation16_spill]] (!%p2668_p5) }
 0x822   : > { %v1248_v19 = vmul.f32 %v3012_v60, %v3006_v5  ;;  %2803 = vmatprep.subr.bf16.mxu0 %v3087_v43  ;;  %v1367_v20 = vpop.permute.xlu1 %1366 }
 0x823   : > { %v1372_v22 = vand.u32 %v1367_v20, %v3354_v3 }
 0x824   : > { %v1249_v21 = vpack.c.bf16 %v1248_v19, %v1248_v19  ;;  %v3480_v19 = vld [vmem:[%s744_s27] ss:$0 sm:$0xff] }
 0x828   : > { %2794 = vmatmul.mubr.msk.bf16.vlgmr.msra.gmra.mrb[4].mxu0 %vm1018_vm8, %v1249_v21 }
 0x829   : > { %v3014_v23 = vpop.eup %3013  ;;  %2804 = vmatpush3.bf16.msra.mxu0 %v1372_v22  ;;  %2805 = vmatprep.mubr.msk.bf16.mxu0 %vm3088_vm2, %v3087_v43 }
 0x82a   : > { %v1364_v24 = vmul.f32 %v3014_v23, %v3008_v7  ;;  %2817 = vmatprep.subr.bf16.mxu0 %v3087_v43 }
 0x82c   : > { %v1365_v25 = vpack.c.bf16 %v1364_v24, %v1364_v24 }
 0x830   : > { %2806 = vmatmul.mubr.msk.bf16.vlgmr.msra.gmra.mrb[8].mxu0 %vm1018_vm8, %v1365_v25 }
 0x831   : > { %2821 = vmatprep.mubr.msk.bf16.mxu0 %vm3088_vm2, %v3087_v43  ;;  %2818 = vmatpush3.bf16.msra.mxu0 %v3459_v9 }
 0x832   : > { %2819 = vmatprep.subr.bf16.mxu0 %v3087_v43 }
 0x835   : > { %2820 = vmatpush3.bf16.msra.mxu0 %v3464_v10 }
 0x836   : > { %2845 = vmatprep.subr.bf16.mxu0 %v3087_v43 }
 0x8f3   : > { %v1176_v26 = vpop.f32.mrb[0].mxu0 }
 0x8f4   : > { %1183 = vrot.lane.b32.xlu1 %v1176_v26, %s3738_s22  ;;  %v2783_v27 = vpop.f32.mrb[1].mxu0  ;;  %s3739_s22 = smov 24  }
 0x8f5   : > { %v1179_v28 = vpop.f32.mrb[2].mxu0 }
 0x8f6   : > { %v2784_v29 = vpop.f32.mrb[3].mxu0  ;;  %v3517_v28 = vld [vmem:[%s3269_s2 + $0x20] sm:$0xff]  }
 0x8f7   : > { %v3522_v29 = vld [vmem:[%s3269_s2 + $0x28] sm:$0xff]  }
 0x8fb   : > { %v1292_v32 = vpop.f32.mrb[4].mxu0 }
 0x8fc   : > { %1299 = vrot.lane.b32.xlu0 %v1292_v32, %s3740_s18  ;;  %v2795_v33 = vpop.f32.mrb[5].mxu0  ;;  %s3761_s18 = scalar_lea.vmem %s3722_s9, %s3219_s20  ;;  %v3527_v32 = vld [vmem:[%s3269_s2 + $0x30] sm:$0xff]  }
 0x8fd   : > { %v1295_v34 = vpop.f32.mrb[6].mxu0  ;;  %v3446_v53 = vld [vmem:[%s3761_s18] ss:$0 sm:$0xff]  ;;  %v3532_v33 = vld [vmem:[%s3269_s2 + $0x38] sm:$0xff]   ;;  %s3762_s18 = scalar_lea.vmem %s3726_s13, %s3219_s20  ;;  %s3763_s20 = smov 40  }
 0x8fe   : > { %v2796_v36 = vpop.f32.mrb[7].mxu0  ;;  %v3541_v34 = vld [vmem:[%s3762_s18] ss:$0 sm:$0xff] }
 0x903   : > { %v1408_v37 = vpop.f32.mrb[8].mxu0 }
 0x904   : > { %1415 = vrot.lane.b32.xlu1 %v1408_v37, %s3739_s22  ;;  %v2807_v38 = vpop.f32.mrb[9].mxu0  ;;  %s3768_s22 = sld [smem:[#allocation15_spill]] (!%p2668_p5) }
 0x905   : > { %v1411_v39 = vpop.f32.mrb[10].mxu0 }
 0x906   : > { %v2808_v40 = vpop.f32.mrb[11].mxu0 }
 0x928   : > { %1683 = vadd.xlane.f32.xlu1 %v1682_v52 }
 0x966   : > { %v1184_v41 = vpop.permute.xlu1 %1183 }
 0x967   : > { %1187 = vst.msk [vmem:[#allocation4] sm:$0x1f] %vm1186_vm10, %v1184_v41 }
 0x96e   : > { %v1300_v45 = vpop.permute.xlu0 %1299 }
 0x96f   : > { %1303 = vst.msk [vmem:[#allocation4] sm:$0x1f] %vm1302_vm11, %v1300_v45 }
 0x976   : > { %v1416_v46 = vpop.permute.xlu1 %1415 }
 0x977   : > { %1419 = vst.msk [vmem:[#allocation4] sm:$0x1f] %vm1418_vm12, %v1416_v46 }
 0x97e   : > { %v1420_v47 = vld [vmem:[#allocation4] sm:$0x1f] }
 0x97f   : > { %v1421_v48 = vpack.c.bf16 %v1420_v47, %v1420_v47 }
 0x981   : > { %2814 = vmatmul.mubr.msk.bf16.vlgmr.msra.gmra.mrb[24].mxu1 %vm906_vm3, %v1421_v48 }
 0x982   : > { %2841 = vmatprep.mubr.msk.bf16.mxu1 %vm3088_vm2, %v3087_v43 }
 0x9b5   : > { %v1684_v63 = vpop.xlane.xlu1 %1683 }
 0x9b6   : > { %v1685_v0 = vmul.f32 0.03125, %v1684_v63 }
 0x9b8   : > { %v1686_v4 = vsub.f32 %v3437_v50, %v1685_v0 }
 0x9ba   : > { %v1687_v7 = vmul.f32 %v1686_v4, %v1686_v4 }
 0x9bc   : > { %v1688_v8 = vsel %vm858_vm1, %v1687_v7, 0.0 }
 0xa54   : > { %v1477_v54 = vpop.f32.mrb[24].mxu1 }
 0xa55   : > { %v1478_v56 = vadd.f32 %v3446_v53, %v1477_v54  ;;  %v2815_v57 = vpop.f32.mrb[25].mxu1 }
 0xa56   : > { %v1480_v58 = vpop.f32.mrb[26].mxu1 }
 0xa57   : > { %v3450_v59 = vadd.f32 %v1478_v56, %v3297_v35  ;;  %v2816_v61 = vpop.f32.mrb[27].mxu1 }
 0xa59   : > { %v1484_v62 = vsel %vm858_vm1, %v3450_v59, 0.0 }
 0xa5a   : > { %1485 = vadd.xlane.f32.xlu0 %v1484_v62 }
 0xae7   : > { %v1486_v1 = vpop.xlane.xlu0 %1485 }
 0xae8   : > { %v1487_v2 = vmul.f32 0.03125, %v1486_v1 }
 0xaea   : > { %v1488_v5 = vsub.f32 %v3450_v59, %v1487_v2 }
 0xaec   : > { %v1489_v6 = vmul.f32 %v1488_v5, %v1488_v5 }
 0xaee   : > { %v1490_v35 = vsel %vm858_vm1, %v1489_v6, 0.0 }
 0xaef   : > { %1491 = vadd.xlane.f32.xlu0 %v1490_v35 }
 0xaf3   : > { %1689 = vadd.xlane.f32.xlu0 %v1688_v8 }
 0xb7c   : > { %v1492_v11 = vpop.xlane.xlu0 %1491 }
 0xb7d   : > { %v1493_v12 = vmul.f32 0.03125, %v1492_v11 }
 0xb7f   : > { %v1494_v13 = vadd.f32 1e-05, %v1493_v12 }
 0xb80   : > { %v1690_v14 = vpop.xlane.xlu0 %1689 }
 0xb81   : > { %3015 = vrsqrt.f32 %v1494_v13  ;;  %v1691_v15 = vmul.f32 0.03125, %v1690_v14 }
 0xb83   : > { %v1692_v16 = vadd.f32 1e-05, %v1691_v15 }
 0xb85   : > { %3017 = vrsqrt.f32 %v1692_v16 }
 0xb8b   : > { %v3016_v17 = vpop.eup %3015 }
 0xb8c   : > { %v1496_v60 = vmul.f32 %v3016_v17, %v1488_v5 }
 0xb8e   : > { %v1503_v20 = vmul.f32 %v3473_v18, %v1496_v60 }
 0xb8f   : > { %v3018_v21 = vpop.eup %3017 }
 0xb90   : > { %v1694_v22 = vmul.f32 %v3018_v21, %v1686_v4  ;;  %v1510_v23 = vadd.f32 %v3480_v19, %v1503_v20  ;;  %v3567_v4 = vld [vmem:[%s760_s3] ss:$0 sm:$0xff]  ;;  %s3764_s3 = smov 8  }
 0xb92   : > { %v1511_v24 = vpack.c.bf16 %v1510_v23, %v1510_v23  ;;  %v1695_v25 = vmul.f32 %v3324_v49, %v1694_v22  ;;  %v3502_v49 = vld [vmem:[%s3269_s2 + $0x8] sm:$0xff]  }
 0xb94   : > { %2822 = vmatmul.mubr.msk.bf16.vlgmr.msra.gmra.mrb[12].mxu0 %vm906_vm3, %v1511_v24  ;;  %v1696_v26 = vadd.f32 %v3331_v51, %v1695_v25  ;;  %v3512_v51 = vld [vmem:[%s3269_s2 + $0x18] sm:$0xff]  }
 0xb95   : > { %2846 = vmatpush3.bf16.msra.mxu0 %v3304_v42  ;;  %2849 = vmatprep.mubr.msk.bf16.mxu0 %vm3088_vm2, %v3087_v43  ;;  %v3497_v42 = vld [vmem:[%s3269_s2] sm:$0xff]  }
 0xb96   : > { %2847 = vmatprep.subr.bf16.mxu0 %v3087_v43  ;;  %v1697_v27 = vpack.c.bf16 %v1696_v26, %v1696_v26  ;;  %2826 = vmatpush3.bf16.msra.mxu1 %v3497_v42 }
 0xb97   : > { %2827 = vmatprep.subr.bf16.mxu1 %v3087_v43 }
 0xb99   : > { %2848 = vmatpush3.bf16.msra.mxu0 %v3311_v44  ;;  %v3507_v44 = vld [vmem:[%s3269_s2 + $0x10] sm:$0xff]  }
 0xb9a   : > { %2853 = vmatprep.subr.bf16.mxu0 %v3087_v43  ;;  %2828 = vmatpush3.bf16.msra.mxu1 %v3502_v49 }
 0xb9b   : > { %2829 = vmatprep.subr.bf16.mxu1 %v3087_v43 }
 0xb9c   : > { %2850 = vmatmul.mubr.msk.bf16.vlgmr.msra.gmra.mrb[16].mxu0 %vm906_vm3, %v1697_v27 }
 0xb9d   : > { %2855 = vmatprep.mubr.msk.bf16.mxu0 %vm3088_vm2, %v3087_v43 }
 0xb9e   : > { %2830 = vmatpush3.bf16.msra.mxu1 %v3507_v44 }
 0xb9f   : > { %2831 = vmatprep.subr.bf16.mxu1 %v3087_v43 }
 0xba2   : > { %2832 = vmatpush3.bf16.msra.mxu1 %v3512_v51 }
 0xba3   : > { %2833 = vmatprep.subr.bf16.mxu1 %v3087_v43 }
 0xba6   : > { %2834 = vmatpush3.bf16.msra.mxu1 %v3517_v28 }
 0xba7   : > { %2835 = vmatprep.subr.bf16.mxu1 %v3087_v43 }
 0xbaa   : > { %2836 = vmatpush3.bf16.msra.mxu1 %v3522_v29 }
 0xbab   : > { %2837 = vmatprep.subr.bf16.mxu1 %v3087_v43 }
 0xbae   : > { %2838 = vmatpush3.bf16.msra.mxu1 %v3527_v32 }
 0xbaf   : > { %2839 = vmatprep.subr.bf16.mxu1 %v3087_v43 }
 0xbb2   : > { %2840 = vmatpush3.bf16.msra.mxu1 %v3532_v33 }
 0xbb3   : > { %2871 = vmatprep.subr.bf16.mxu1 %v3087_v43 }
 0xc67   : > { %v1567_v36 = vpop.f32.mrb[12].mxu0 }
 0xc68   : > { %v1568_v37 = vadd.f32 %v3541_v34, %v1567_v36  ;;  %v2823_v38 = vpop.f32.mrb[13].mxu0 }
 0xc69   : > { %v1570_v39 = vpop.f32.mrb[14].mxu0 }
 0xc6a   : > { %v2646_v40 = vmul.f32 -1.702, %v1568_v37  ;;  %v2824_v41 = vpop.f32.mrb[15].mxu0 }
 0xc6c   : > { %v1575_v45 = vmul.f32 1.442695, %v2646_v40 }
 0xc6e   : > { %3019 = vpow2.f32 %v1575_v45 }
 0xc6f   : > { %v1735_v46 = vpop.f32.mrb[16].mxu0 }
 0xc70   : > { %v1736_v47 = vadd.f32 %v3343_v55, %v1735_v46  ;;  %v2851_v48 = vpop.f32.mrb[17].mxu0 }
 0xc71   : > { %v1738_v52 = vpop.f32.mrb[18].mxu0 }
 0xc72   : > { %v3545_v54 = vpack.c.bf16 %v1736_v47, %v1736_v47  ;;  %v2852_v56 = vpop.f32.mrb[19].mxu0  ;;  %v1741_v1 = vmul.f32 0.35355338, %v1736_v47 }
 0xc74   : > { %1745 = vrot.lane.b32.xlu0 %v3545_v54, %s3090_s23  ;;  %v1742_v2 = vpack.c.bf16 %v1741_v1, %v1741_v1 }
 0xc78   : > { %v3020_v57 = vpop.eup %3019  ;;  %1857 = vrot.lane.b32.xlu0 %v3545_v54, %s3093_s25 }
 0xc79   : > { %v1577_v58 = vadd.f32 1.0, %v3020_v57 }
 0xc7b   : > { %3021 = vrcp.f32 %v1577_v58 }
 0xc7c   : > { %1972 = vrot.lane.b32.xlu0 %v3545_v54, %s3092_s26  ;;  %s3766_s26 = smov 24  }
 0xc80   : > { %2087 = vrot.lane.b32.xlu0 %v3545_v54, %s3096_s0 }
 0xc85   : > { %v3022_v55 = vpop.eup %3021 }
 0xc86   : > { %v1580_v61 = vmul.f32 %v3022_v55, %v1568_v37 }
 0xc88   : > { %v1581_v62 = vpack.c.bf16 %v1580_v61, %v1580_v61 }
 0xc8a   : > { %2842 = vmatmul.mubr.bf16.vlgmr.msra.gmra.mrb[28].mxu1 %v1581_v62 }
 0xc8b   : > { %2873 = vmatprep.mubr.msk.bf16.mxu1 %vm3088_vm2, %v3087_v43 }
 0xce6   : > { %v1746_v63 = vpop.permute.xlu0 %1745 }
 0xce7   : > { %v1751_v0 = vsel %vm956_vm4, %v1746_v63, 0 }
 0xce8   : > { %2854 = vmatpush3.bf16.xpose.msra.mxu0 %v1751_v0 }
 0xce9   : > { %2859 = vmatprep.subr.bf16.mxu0 %v3087_v43 }
 0xcea   : > { %v1858_v27 = vpop.permute.xlu0 %1857 }
 0xceb   : > { %v1863_v37 = vsel %vm956_vm4, %v1858_v27, 0 }
 0xcee   : > { %v1973_v38 = vpop.permute.xlu0 %1972 }
 0xcef   : > { %2856 = vmatmul.mubr.msk.bf16.vlgmr.msra.gmra.mrb[20].mxu0 %vm956_vm4, %v1742_v2  ;;  %v1978_v40 = vsel %vm956_vm4, %v1973_v38, 0 }
 0xcf0   : > { %2861 = vmatprep.mubr.msk.bf16.mxu0 %vm3088_vm2, %v3087_v43 }
 0xcf2   : > { %v2088_v41 = vpop.permute.xlu0 %2087 }
 0xcf3   : > { %v2093_v46 = vsel %vm956_vm4, %v2088_v41, 0 }
 0xd5d   : > { %v1670_v5 = vpop.f32.mrb[28].mxu1 }
 0xd5e   : > { %v1671_v6 = vadd.f32 %v3567_v4, %v1670_v5  ;;  %v2843_v7 = vpop.f32.mrb[29].mxu1 }
 0xd5f   : > { %v1673_v35 = vpop.f32.mrb[30].mxu1 }
 0xd60   : > { %v1676_v8 = vadd.f32 %v1671_v6, %v3450_v59  ;;  %v2844_v11 = vpop.f32.mrb[31].mxu1 }
 0xd62   : > { %1677 = vst.msk [vmem:[#allocation2] sm:$0x1f] %vm858_vm1, %v1676_v8 }
 0xd63   : > { %1679 = vst.msk [vmem:[#allocation3] sm:$0x1] %vm1678_vm13, %v1676_v8 }
 0xdc2   : > { %v1787_v12 = vpop.f32.mrb[20].mxu0 }
 0xdc3   : > { %v2857_v13 = vpop.f32.mrb[21].mxu0  ;;  %v1793_v14 = vsel %vm1003_vm7, %v1787_v12, -inf }
 0xdc4   : > { %1794 = vmax.xlane.f32.xlu1 %v1793_v14  ;;  %v1790_v15 = vpop.f32.mrb[22].mxu0 }
 0xdc5   : > { %v2858_v16 = vpop.f32.mrb[23].mxu0 }
 0xe51   : > { %v1795_v17 = vpop.xlane.xlu1 %1794 }
 0xe52   : > { %v1796_v60 = vsub.f32 %v1787_v12, %v1795_v17 }
 0xe54   : > { %v1797_v20 = vmul.f32 1.442695, %v1796_v60 }
 0xe56   : > { %3023 = vpow2.f32 %v1797_v20 }
 0xe60   : > { %v3024_v21 = vpop.eup %3023 }
 0xe61   : > { %v1799_v22 = vsel %vm1003_vm7, %v3024_v21, 0.0 }
 0xe62   : > { %1800 = vadd.xlane.f32.xlu1 %v1799_v22 }
 0xe73   : > { %1805 = vrot.lane.b32.xlu1 %v3545_v54, %s3089_s24  ;;  %s3765_s24 = smov 16  }
 0xe77   : > { %1855 = vrot.lane.b32.xlu1 %v1742_v2, %s3094_s21 }
 0xe7b   : > { %1970 = vrot.lane.b32.xlu1 %v1742_v2, %s3095_s29  ;;  %s3767_s29 = sld [smem:[#allocation17_spill]] (!%p2668_p5) }
 0xe7f   : > { %2085 = vrot.lane.b32.xlu1 %v1742_v2, %s3097_s1 }
 0xeef   : > { %v1801_v59 = vpop.xlane.xlu1 %1800 }
 0xef0   : > { %3025 = vrcp.f32 %v1801_v59 }
 0xef3   : > { %v1806_v23 = vpop.permute.xlu1 %1805 }
 0xef4   : > { %v1811_v24 = vand.u32 %v1806_v23, %v3354_v3 }
 0xef6   : > { %2860 = vmatpush3.bf16.msra.mxu0 %v1811_v24 }
 0xef7   : > { %2865 = vmatprep.subr.bf16.mxu0 %v3087_v43  ;;  %v1856_v39 = vpop.permute.xlu1 %1855 }
 0xefa   : > { %v3026_v25 = vpop.eup %3025 }
 0xefb   : > { %v1803_v26 = vmul.f32 %v3026_v25, %v3024_v21  ;;  %v1971_v45 = vpop.permute.xlu1 %1970 }
 0xefd   : > { %v1804_v36 = vpack.c.bf16 %v1803_v26, %v1803_v26 }
 0xeff   : > { %2862 = vmatmul.mubr.msk.bf16.vlgmr.msra.gmra.mrb[24].mxu0 %vm1018_vm8, %v1804_v36  ;;  %v2086_v47 = vpop.permute.xlu1 %2085 }
 0xf00   : > { %2866 = vmatpush3.bf16.xpose.msra.mxu0 %v1863_v37  ;;  %2867 = vmatprep.mubr.msk.bf16.mxu0 %vm3088_vm2, %v3087_v43 }
 0xf01   : > { %2877 = vmatprep.subr.bf16.mxu0 %v3087_v43 }
 0xf07   : > { %2868 = vmatmul.mubr.msk.bf16.vlgmr.msra.gmra.mrb[28].mxu0 %vm956_vm4, %v1856_v39 }
 0xf08   : > { %2878 = vmatpush3.bf16.xpose.msra.mxu0 %v1978_v40  ;;  %2879 = vmatprep.mubr.msk.bf16.mxu0 %vm3088_vm2, %v3087_v43 }
 0xf09   : > { %2889 = vmatprep.subr.bf16.mxu0 %v3087_v43 }
 0xf0f   : > { %2880 = vmatmul.mubr.msk.bf16.vlgmr.msra.gmra.mrb[32].mxu0 %vm956_vm4, %v1971_v45 }
 0xf10   : > { %2890 = vmatpush3.bf16.xpose.msra.mxu0 %v2093_v46  ;;  %2891 = vmatprep.mubr.msk.bf16.mxu0 %vm3088_vm2, %v3087_v43 }
 0xf11   : > { %2901 = vmatprep.subr.bf16.mxu0 %v3087_v43 }
 0xf17   : > { %2892 = vmatmul.mubr.msk.bf16.vlgmr.msra.gmra.mrb[36].mxu0 %vm956_vm4, %v2086_v47 }
 0xf18   : > { %2902 = vmatpush3.bf16.msra.mxu0 %v3420_v30  ;;  %2905 = vmatprep.mubr.msk.bf16.mxu0 %vm3088_vm2, %v3087_v43 }
 0xf19   : > { %2903 = vmatprep.subr.bf16.mxu0 %v3087_v43 }
 0xf1c   : > { %2904 = vmatpush3.bf16.msra.mxu0 %v3424_v31 }
 0xf1d   : > { %2917 = vmatprep.subr.bf16.mxu0 %v3087_v43 }
 0xfd2   : > { %v1847_v48 = vpop.f32.mrb[24].mxu0 }
 0xfd3   : > { %1853 = vst.msk [vmem:[#allocation4] sm:$0x1f] %vm1069_vm9, %v1847_v48  ;;  %v2863_v52 = vpop.f32.mrb[25].mxu0 }
 0xfd4   : > { %v1850_v56 = vpop.f32.mrb[26].mxu0 }
 0xfd5   : > { %v2864_v57 = vpop.f32.mrb[27].mxu0 }
 0xfda   : > { %v1899_v58 = vpop.f32.mrb[28].mxu0 }
 0xfdb   : > { %v2869_v55 = vpop.f32.mrb[29].mxu0  ;;  %v1905_v61 = vsel %vm1003_vm7, %v1899_v58, -inf }
 0xfdc   : > { %1906 = vmax.xlane.f32.xlu0 %v1905_v61  ;;  %v1902_v30 = vpop.f32.mrb[30].mxu0 }
 0xfdd   : > { %v2870_v62 = vpop.f32.mrb[31].mxu0 }
 0xfe2   : > { %v2014_v63 = vpop.f32.mrb[32].mxu0 }
 0xfe3   : > { %v2881_v0 = vpop.f32.mrb[33].mxu0  ;;  %v2020_v1 = vsel %vm1003_vm7, %v2014_v63, -inf }
 0xfe4   : > { %2021 = vmax.xlane.f32.xlu1 %v2020_v1  ;;  %v2017_v31 = vpop.f32.mrb[34].mxu0 }
 0xfe5   : > { %v2882_v2 = vpop.f32.mrb[35].mxu0 }
 0xfea   : > { %v2129_v5 = vpop.f32.mrb[36].mxu0 }
 0xfeb   : > { %v2893_v6 = vpop.f32.mrb[37].mxu0  ;;  %v2135_v7 = vsel %vm1003_vm7, %v2129_v5, -inf }
 0xfec   : > { %2136 = vmax.xlane.f32.xlu0 %v2135_v7  ;;  %v2132_v35 = vpop.f32.mrb[38].mxu0 }
 0xfed   : > { %v2894_v8 = vpop.f32.mrb[39].mxu0 }
 0xff5   : > { %2032 = vrot.lane.b32.xlu1 %v3545_v54, %s3098_s17 }
0x1069   : > { %v1907_v11 = vpop.xlane.xlu0 %1906 }
0x106a   : > { %v1908_v12 = vsub.f32 %v1899_v58, %v1907_v11 }
0x106c   : > { %v1909_v13 = vmul.f32 1.442695, %v1908_v12 }
0x106e   : > { %3027 = vpow2.f32 %v1909_v13 }
0x1071   : > { %v2022_v14 = vpop.xlane.xlu1 %2021 }
0x1072   : > { %v2023_v15 = vsub.f32 %v2014_v63, %v2022_v14 }
0x1074   : > { %v2024_v16 = vmul.f32 1.442695, %v2023_v15 }
0x1075   : > { %v2033_v37 = vpop.permute.xlu1 %2032 }
0x1076   : > { %3029 = vpow2.f32 %v2024_v16  ;;  %v2038_v46 = vand.u32 %v2033_v37, %v3354_v3 }
0x1078   : > { %v3028_v17 = vpop.eup %3027 }
0x1079   : > { %v2137_v60 = vpop.xlane.xlu0 %2136  ;;  %v1911_v20 = vsel %vm1003_vm7, %v3028_v17, 0.0 }
0x107a   : > { %v2138_v21 = vsub.f32 %v2129_v5, %v2137_v60  ;;  %1912 = vadd.xlane.f32.xlu0 %v1911_v20 }
0x107c   : > { %v2139_v22 = vmul.f32 1.442695, %v2138_v21 }
0x107e   : > { %3031 = vpow2.f32 %v2139_v22 }
0x1080   : > { %v3030_v59 = vpop.eup %3029 }
0x1081   : > { %v2026_v23 = vsel %vm1003_vm7, %v3030_v59, 0.0 }
0x1082   : > { %2027 = vadd.xlane.f32.xlu0 %v2026_v23 }
0x1088   : > { %v3032_v24 = vpop.eup %3031 }
0x1089   : > { %v2141_v25 = vsel %vm1003_vm7, %v3032_v24, 0.0 }
0x108a   : > { %2142 = vadd.xlane.f32.xlu1 %v2141_v25 }
0x1098   : > { %1917 = vrot.lane.b32.xlu0 %v3545_v54, %s3099_s8 }
0x109b   : > { %2147 = vrot.lane.b32.xlu1 %v3545_v54, %s3763_s20 }
0x1107   : > { %v1913_v26 = vpop.xlane.xlu0 %1912 }
0x1108   : > { %3033 = vrcp.f32 %v1913_v26 }
0x110f   : > { %v2028_v27 = vpop.xlane.xlu0 %2027 }
0x1110   : > { %3035 = vrcp.f32 %v2028_v27 }
0x1112   : > { %v3034_v36 = vpop.eup %3033 }
0x1113   : > { %v1915_v38 = vmul.f32 %v3034_v36, %v3028_v17  ;;  %v1918_v39 = vpop.permute.xlu0 %1917 }
0x1114   : > { %v1923_v40 = vand.u32 %v1918_v39, %v3354_v3 }
0x1115   : > { %v1916_v45 = vpack.c.bf16 %v1915_v38, %v1915_v38 }
0x1116   : > { %2872 = vmatpush3.bf16.msra.mxu1 %v1923_v40 }
0x1117   : > { %v2143_v41 = vpop.xlane.xlu1 %2142  ;;  %2883 = vmatprep.subr.bf16.mxu1 %v3087_v43 }
0x1118   : > { %3037 = vrcp.f32 %v2143_v41 }
0x1119   : > { %2874 = vmatmul.mubr.msk.bf16.vlgmr.msra.gmra.mrb[32].mxu1 %vm1018_vm8, %v1916_v45 }
0x111a   : > { %v3036_v54 = vpop.eup %3035  ;;  %2884 = vmatpush3.bf16.msra.mxu1 %v2038_v46  ;;  %2885 = vmatprep.mubr.msk.bf16.mxu1 %vm3088_vm2, %v3087_v43 }
0x111b   : > { %v2030_v47 = vmul.f32 %v3036_v54, %v3030_v59  ;;  %2895 = vmatprep.subr.bf16.mxu1 %v3087_v43  ;;  %v2148_v48 = vpop.permute.xlu1 %2147 }
0x111c   : > { %v2153_v56 = vand.u32 %v2148_v48, %v3354_v3 }
0x111d   : > { %v2031_v52 = vpack.c.bf16 %v2030_v47, %v2030_v47 }
0x1121   : > { %2886 = vmatmul.mubr.msk.bf16.vlgmr.msra.gmra.mrb[36].mxu1 %vm1018_vm8, %v2031_v52 }
0x1122   : > { %v3038_v57 = vpop.eup %3037  ;;  %2896 = vmatpush3.bf16.msra.mxu1 %v2153_v56  ;;  %2897 = vmatprep.mubr.msk.bf16.mxu1 %vm3088_vm2, %v3087_v43 }
0x1123   : > { %v2145_v58 = vmul.f32 %v3038_v57, %v3032_v24  ;;  %2909 = vmatprep.subr.bf16.mxu1 %v3087_v43 }
0x1125   : > { %v2146_v55 = vpack.c.bf16 %v2145_v58, %v2145_v58  ;;  %v3045_v58 = vld [vmem:[%s3767_s29] sm:$0xff] (!%p2668_p5)  }
0x1129   : > { %2898 = vmatmul.mubr.msk.bf16.vlgmr.msra.gmra.mrb[40].mxu1 %vm1018_vm8, %v2146_v55  ;;  %v3104_v55 = vmov (!%p2668_p5), 0.0  }
0x112a   : > { %2910 = vmatpush3.bf16.msra.mxu1 %v3459_v9  ;;  %2913 = vmatprep.mubr.msk.bf16.mxu1 %vm3088_vm2, %v3087_v43 }
0x112b   : > { %2911 = vmatprep.subr.bf16.mxu1 %v3087_v43 }
0x112e   : > { %2912 = vmatpush3.bf16.msra.mxu1 %v3464_v10 }
0x11ec   : > { %v1959_v3 = vpop.f32.mrb[32].mxu1 }
0x11ed   : > { %1966 = vrot.lane.b32.xlu1 %v1959_v3, %s3764_s3  ;;  %v2875_v61 = vpop.f32.mrb[33].mxu1  ;;  %v3046_v3 = vld [vmem:[%s3767_s29 + $0x8] sm:$0xff] (!%p2668_p5)  }
0x11ee   : > { %v1962_v30 = vpop.f32.mrb[34].mxu1 }
0x11ef   : > { %v2876_v62 = vpop.f32.mrb[35].mxu1 }
0x11f4   : > { %v2074_v63 = vpop.f32.mrb[36].mxu1 }
0x11f5   : > { %2081 = vrot.lane.b32.xlu0 %v2074_v63, %s3765_s24  ;;  %v2887_v0 = vpop.f32.mrb[37].mxu1 }
0x11f6   : > { %v2077_v1 = vpop.f32.mrb[38].mxu1  ;;  %v2669_v0 = vld [vmem:[%s3768_s22] ss:$0 sm:$0xff] (!%p2668_p5) }
0x11f7   : > { %v2888_v31 = vpop.f32.mrb[39].mxu1 }
0x11f8   : > { %v2670_v31 = vld [vmem:[%s3769_s16] ss:$0 sm:$0xff] (!%p2668_p5) }
0x11fc   : > { %v2189_v9 = vpop.f32.mrb[40].mxu1 }
0x11fd   : > { %2196 = vrot.lane.b32.xlu1 %v2189_v9, %s3766_s26  ;;  %v2899_v2 = vpop.f32.mrb[41].mxu1 }
0x11fe   : > { %v2192_v5 = vpop.f32.mrb[42].mxu1 }
0x11ff   : > { %v2900_v6 = vpop.f32.mrb[43].mxu1 }
0x125f   : > { %v1967_v7 = vpop.permute.xlu1 %1966 }
0x1260   : > { %1969 = vst.msk [vmem:[#allocation4] sm:$0x1f] %vm1186_vm10, %v1967_v7 }
0x1267   : > { %v2082_v10 = vpop.permute.xlu0 %2081 }
0x1268   : > { %2084 = vst.msk [vmem:[#allocation4] sm:$0x1f] %vm1302_vm11, %v2082_v10 }
0x126f   : > { %v2197_v35 = vpop.permute.xlu1 %2196 }
0x1270   : > { %2199 = vst.msk [vmem:[#allocation4] sm:$0x1f] %vm1418_vm12, %v2197_v35 }
0x1277   : > { %v2200_v8 = vld [vmem:[#allocation4] sm:$0x1f] }
0x1278   : > { %v2201_v11 = vpack.c.bf16 %v2200_v8, %v2200_v8 }
0x127a   : > { %2906 = vmatmul.mubr.msk.bf16.vlgmr.msra.gmra.mrb[40].mxu0 %vm906_vm3, %v2201_v11 }
0x127b   : > { %2918 = vmatpush3.bf16.msra.mxu0 %v3497_v42  ;;  %2933 = vmatprep.mubr.msk.bf16.mxu0 %vm3088_vm2, %v3087_v43 }
0x127c   : > { %2919 = vmatprep.subr.bf16.mxu0 %v3087_v43 }
0x127f   : > { %2920 = vmatpush3.bf16.msra.mxu0 %v3502_v49 }
0x1280   : > { %2921 = vmatprep.subr.bf16.mxu0 %v3087_v43 }
0x1283   : > { %2922 = vmatpush3.bf16.msra.mxu0 %v3507_v44 }
0x1284   : > { %2923 = vmatprep.subr.bf16.mxu0 %v3087_v43 }
0x1287   : > { %2924 = vmatpush3.bf16.msra.mxu0 %v3512_v51 }
0x1288   : > { %2925 = vmatprep.subr.bf16.mxu0 %v3087_v43 }
0x128b   : > { %2926 = vmatpush3.bf16.msra.mxu0 %v3517_v28 }
0x128c   : > { %2927 = vmatprep.subr.bf16.mxu0 %v3087_v43 }
0x128f   : > { %2928 = vmatpush3.bf16.msra.mxu0 %v3522_v29 }
0x1290   : > { %2929 = vmatprep.subr.bf16.mxu0 %v3087_v43 }
0x1293   : > { %2930 = vmatpush3.bf16.msra.mxu0 %v3527_v32 }
0x1294   : > { %2931 = vmatprep.subr.bf16.mxu0 %v3087_v43 }
0x1297   : > { %2932 = vmatpush3.bf16.msra.mxu0 %v3532_v33 }
0x1298   : > { %2937 = vmatprep.subr.bf16.mxu0 (!%p2668_p5), %v3104_v55 }
0x134d   : > { %v2239_v42 = vpop.f32.mrb[40].mxu0 }
0x134e   : > { %v2240_v49 = vadd.f32 %v3446_v53, %v2239_v42  ;;  %v2907_v44 = vpop.f32.mrb[41].mxu0 }
0x134f   : > { %v2242_v51 = vpop.f32.mrb[42].mxu0 }
0x1350   : > { %v2245_v12 = vadd.f32 %v2240_v49, %v3437_v50  ;;  %v2908_v28 = vpop.f32.mrb[43].mxu0 }
0x1352   : > { %v2246_v13 = vsel %vm858_vm1, %v2245_v12, 0.0 }
0x1353   : > { %2247 = vadd.xlane.f32.xlu0 %v2246_v13 }
0x13e0   : > { %v2248_v29 = vpop.xlane.xlu0 %2247 }
0x13e1   : > { %v2249_v14 = vmul.f32 0.03125, %v2248_v29 }
0x13e3   : > { %v2250_v15 = vsub.f32 %v2245_v12, %v2249_v14 }
0x13e5   : > { %v2251_v16 = vmul.f32 %v2250_v15, %v2250_v15 }
0x13e7   : > { %v2252_v32 = vsel %vm858_vm1, %v2251_v16, 0.0 }
0x13e8   : > { %2253 = vadd.xlane.f32.xlu1 %v2252_v32 }
0x1475   : > { %v2254_v43 = vpop.xlane.xlu1 %2253 }
0x1476   : > { %v2255_v33 = vmul.f32 0.03125, %v2254_v43 }
0x1478   : > { %v2256_v17 = vadd.f32 1e-05, %v2255_v33 }
0x147a   : > { %3039 = vrsqrt.f32 %v2256_v17 }
0x1484   : > { %v3040_v53 = vpop.eup %3039 }
0x1485   : > { %v2258_v60 = vmul.f32 %v3040_v53, %v2250_v15 }
0x1487   : > { %v2259_v20 = vmul.f32 %v3473_v18, %v2258_v60 }
0x1489   : > { %v2260_v50 = vadd.f32 %v3480_v19, %v2259_v20 }
0x148b   : > { %v2261_v21 = vpack.c.bf16 %v2260_v50, %v2260_v50 }
0x148d   : > { %2914 = vmatmul.mubr.msk.bf16.vlgmr.msra.gmra.mrb[44].mxu1 %vm906_vm3, %v2261_v21 }
0x1560   : > { %v2299_v22 = vpop.f32.mrb[44].mxu1 }
0x1561   : > { %v2300_v59 = vadd.f32 %v3541_v34, %v2299_v22  ;;  %v2915_v23 = vpop.f32.mrb[45].mxu1 }
0x1562   : > { %v2302_v24 = vpop.f32.mrb[46].mxu1 }
0x1563   : > { %v2667_v25 = vmul.f32 -1.702, %v2300_v59  ;;  %v2916_v26 = vpop.f32.mrb[47].mxu1 }
0x1565   : > { %v2307_v27 = vmul.f32 1.442695, %v2667_v25 }
0x1567   : > { %3041 = vpow2.f32 %v2307_v27 }
0x1571   : > { %v3042_v36 = vpop.eup %3041 }
0x1572   : > { %v2309_v37 = vadd.f32 1.0, %v3042_v36 }
0x1574   : > { %3043 = vrcp.f32 %v2309_v37 }
0x157e   : > { %v3044_v38 = vpop.eup %3043 }
0x157f   : > { %v2312_v39 = vmul.f32 %v3044_v38, %v2300_v59 }
0x1581   : > { %v2313_v18 = vpack.c.bf16 %v2312_v39, %v2312_v39 }
0x1583   : > { %2934 = vmatmul.mubr.bf16.vlgmr.msra.gmra.mrb[44].mxu0 %v2313_v18 }
0x1584   : > { %2941 = vmatprep.mubr.msk.bf16.mxu0 (!%p2668_p5), %vm3105_vm15, %v3104_v55  ;;  %2938 = vmatpush3.bf16.msra.mxu0 (!%p2668_p5), %v3045_v58 }
0x1585   : > { %2939 = vmatprep.subr.bf16.mxu0 (!%p2668_p5), %v3104_v55 }
0x1588   : > { %2940 = vmatpush3.bf16.msra.mxu0 (!%p2668_p5), %v3046_v3 }
0x1656   : > { %v2348_v19 = vpop.f32.mrb[44].mxu0  ;;  %2360 = sbr.rel (%p2668_p5) target bundleno = 6262 (0x1876), region = 104 }
0x1657   : > { %v2349_v40 = vadd.f32 %v3567_v4, %v2348_v19  ;;  %v2935_v41 = vpop.f32.mrb[45].mxu0 }
0x1658   : > { %v2351_v45 = vpop.f32.mrb[46].mxu0 }
0x1659   : > { %v2354_v46 = vadd.f32 %v2349_v40, %v2245_v12  ;;  %v2936_v34 = vpop.f32.mrb[47].mxu0 }
0x165b   : > { %2355 = vst.msk [vmem:[#allocation2 + $0x8] sm:$0x1f] %vm858_vm1, %v2354_v46 }
0x165c   : > { %2356 = vst.msk [vmem:[#allocation3 + $0x1] sm:$0x1] %vm1678_vm13, %v2354_v46 }
0x1663   : > { %v2361_v54 = vld [vmem:[#allocation3] sm:$0x3] }
0x1664   : > { %v2365_v47 = vsel %vm2364_vm14, %v2361_v54, 0.0 }
0x1665   : > { %2366 = vadd.xlane.f32.xlu0 %v2365_v47 }
0x16f2   : > { %v2367_v48 = vpop.xlane.xlu0 %2366 }
0x16f3   : > { %v2368_v52 = vmul.f32 0.03125, %v2367_v48 }
0x16f5   : > { %v2369_v56 = vsub.f32 %v2361_v54, %v2368_v52 }
0x16f7   : > { %v2370_v4 = vmul.f32 %v2369_v56, %v2369_v56 }
0x16f9   : > { %v2371_v57 = vsel %vm2364_vm14, %v2370_v4, 0.0 }
0x16fa   : > { %2372 = vadd.xlane.f32.xlu0 %v2371_v57 }
0x1787   : > { %v2373_v61 = vpop.xlane.xlu0 %2372 }
0x1788   : > { %v2374_v30 = vmul.f32 0.03125, %v2373_v61 }
0x178a   : > { %v2375_v62 = vadd.f32 1e-05, %v2374_v30 }
0x178c   : > { %3047 = vrsqrt.f32 %v2375_v62 }
0x1796   : > { %v3048_v63 = vpop.eup %3047 }
0x1797   : > { %v2377_v1 = vmul.f32 %v3048_v63, %v2369_v56 }
0x1799   : > { %v2384_v9 = vmul.f32 %v2669_v0, %v2377_v1 }
0x179b   : > { %v2391_v2 = vadd.f32 %v2670_v31, %v2384_v9 }
0x179d   : > { %v2392_v5 = vpack.c.bf16 %v2391_v2, %v2391_v2 }
0x179f   : > { %2942 = vmatmul.mubr.msk.bf16.vlgmr.msra.gmra.mrb[0].mxu0 %vm906_vm3, %v2392_v5 }
0x1872   : > { %v2446_v6 = vpop.f32.mrb[0].mxu0 }
0x1873   : > { %2452 = vst.msk [vmem:[#allocation5] sm:$0x3] %vm2364_vm14, %v2446_v6  ;;  %v2943_v7 = vpop.f32.mrb[1].mxu0 }
0x1874   : > { %v2449_v10 = vpop.f32.mrb[2].mxu0 }
0x1875   : > { %v2944_v35 = vpop.f32.mrb[3].mxu0 }
0x1876 PF: > { %p2949_p6 = scmp.eq.s32.totalorder %s3213_s30, 1  ;;  %s3106_s27 = smov [#allocation5]  }
0x1877   : > { %s2460_s18 = sshll.u32 %s3106_s27, 4  ;;  %s2461_s18 = int_to_ptr.vmem [resolvable:$true] %s2460_s18 }
0x1878   : > { %s3049_s2 = scalar_lea.vmem %s2461_s18, 32  ;;  %p3056_p10 = scmp.lt.s32.totalorder %s2461_s18, %s2461_s18 }
0x1879   : > { %p3050_p7 = scmp.ne.s32.totalorder %s2461_s18, %s3049_s2  ;;  %p3057_p11 = scmp.lt.s32.totalorder %s3049_s2, %s3049_s2 }
0x187b   : > { %p3051_p8 = pnand %p3050_p7, %p2949_p6  ;;  %p3058_p12 = por %p3057_p11, %p3056_p10 }
0x187d   : > { %p3052_p9 = pneg %p3051_p8 }
0x187f   : > { %p3059_p13 = pnand %p3058_p12, %p3052_p9 }
0x1881   : > { %3062 = shalt.err (!%p3059_p13)
}
0x1882   : > { %s3770_s3 = sld [smem:[#allocation18_spill]] }
0x1888   : > { %s3063_s24 = scalar_lea.hbm %s3770_s3, 32 }
0x1889   : > { %p3064_p0 = scmp.ne.s32.totalorder %s3770_s3, %s3063_s24  ;;  %p3069_p3 = scmp.lt.u32.totalorder %s3063_s24, %s3770_s3 }
0x188b   : > { %p3065_p1 = pnand %p3064_p0, %p2949_p6 }
0x188d   : > { %p3066_p2 = pneg %p3065_p1 }
0x188f   : > { %p3071_p4 = pnand %p3069_p3, %p3066_p2 }
0x1891   : > { %3074 = shalt.err (!%p3071_p4)
}
0x1892   : > { %2946 = dma.vmem_to_hbm [thread:$0]  (%p2949_p6), %s2461_s18, 32, %s3770_s3, [#allocation6]  }
0x1893   : > { %3080 = dma.done.wait (%p2949_p6), [#allocation6], 32  }
0x1894   : > { %3082 = vsyncadd (%p2949_p6), [#allocation6], 4294967264 }
0x1895 PF: > { %s3771_s8 = sld [smem:[#allocation8_spill]] }
0x189b   : > { %s30_s0 = sadd.s32 1, %s3771_s8  }
0x189c   : > { %p27_p5 = scmp.ge.s32.totalorder %s30_s0, 4  }
0x189e   :  { %29 = sbr.rel (!%p27_p5) target bundleno = 12 (0xc), region = 165 }
0x18a5   :  { %2473 = vsyncpa [#allocation6], 1 }
0x18a6   :  { %2475 = vsyncpa [#allocation6 + $0x1], 1 }

</bundles_post_ra>
